<compile_context>
chip_gen: v7x
topology: tpu7x:2x2x1
jax: 0.10.0
libtpu: 0.0.40
codegen_flags: <defaults>
</compile_context>

<pallas_src>
import math
import functools

import jax
import jax.numpy as jnp
from jax.experimental import pallas as pl
from jax.experimental.pallas import tpu as pltpu


# Per-layer packing order (shared by the wrapper packer and the kernel consumer).
ENC_MAT_KEYS = ("wqkv", "wo", "w1", "w2")
ENC_VEC_KEYS = ("bqkv", "bo", "ln1_g", "ln1_b", "b1", "b2", "ln2_g", "ln2_b")
DEC_MAT_KEYS = ("sa_wqkv", "sa_wo", "ca_wq", "ca_wkv", "ca_wo", "w1", "w2")
DEC_VEC_KEYS = ("sa_bqkv", "sa_bo", "ca_bq", "ca_bkv", "ca_bo",
                "ln1_g", "ln1_b", "ln2_g", "ln2_b", "ln3_g", "ln3_b", "b1", "b2")


# ----------------------------------------------------------------------------
# The single fused Pallas kernel
# ----------------------------------------------------------------------------

def _fused_forward_kernel(feats_ref, extra_ref, pe_ref, vec_ref, w_ref, out_ref,
                          *, B, S, D, H, DFF, D_IN, num_enc, num_dec):
    M = B * S
    Dh = D // H
    scale = 1.0 / math.sqrt(Dh)
    bf16 = jnp.bfloat16
    NPAD = out_ref.shape[-1]                  # lane-dense output width (128)

    # Sequential cursors into the packed weight / vector slabs.  Everything is
    # statically unrolled, so these are plain Python ints.
    mat_i = [0]
    vec_i = [0]

    def W(rows, cols):                        # next weight matrix, bf16 (rows, cols)
        w = w_ref[mat_i[0], :rows, :cols]
        mat_i[0] += 1
        return w

    def V(width):                             # next bias / LN vector, f32 (1, width)
        v = vec_ref[vec_i[0]:vec_i[0] + 1, :width]
        vec_i[0] += 1
        return v

    def mm(x, w):                             # bf16 MXU matmul, f32 accumulation
        return jnp.dot(x.astype(bf16), w, preferred_element_type=jnp.float32)

    def layernorm(x, g, b):                   # torch LayerNorm: biased var, eps=1e-5
        mu = jnp.mean(x, axis=-1, keepdims=True)
        xc = x - mu
        var = jnp.mean(xc * xc, axis=-1, keepdims=True)
        return xc * jax.lax.rsqrt(var + 1e-5) * g + b

    def attend(q, k, v, wo, bo, mask):
        # q, k, v: (M, D) f32.  Per-head scores/AV (static unroll, all in VMEM),
        # heads merged by a single lane-concat and ONE (M,D)@(D,D) output dot.
        outs = []
        for h in range(H):
            sl = slice(h * Dh, (h + 1) * Dh)
            qh = q[:, sl].reshape(B, S, Dh).astype(bf16)
            kh = k[:, sl].reshape(B, S, Dh).astype(bf16)
            vh = v[:, sl].reshape(B, S, Dh).astype(bf16)
            s = jnp.einsum("bqd,bkd->bqk", qh, kh,
                           preferred_element_type=jnp.float32) * scale
            if mask is not None:
                s = s + mask[None]
            s = s - jnp.max(s, axis=-1, keepdims=True)
            p = jnp.exp(s)
            # approx reciprocal runs on the EUP (separate slot); a few-ULP
            # deviation from exact softmax is acceptable for inference.
            p = p * pl.reciprocal(jnp.sum(p, axis=-1, keepdims=True), approx=True)
            oh = jnp.einsum("bqk,bkd->bqd", p.astype(bf16), vh,
                            preferred_element_type=jnp.float32)
            outs.append(oh.reshape(M, Dh))
        o = outs[0] if H == 1 else jnp.concatenate(outs, axis=-1)   # (M, D)
        return mm(o, wo) + bo

    def ffn(x, w1, b1, w2, b2):
        hidden = jnp.maximum(mm(x, w1) + b1, 0.0)
        return mm(hidden, w2) + b2

    # Causal mask (== get_tgt_mask): 0 on/below diagonal, large-negative above.
    row = jax.lax.broadcasted_iota(jnp.int32, (S, S), 0)
    col = jax.lax.broadcasted_iota(jnp.int32, (S, S), 1)
    causal = jnp.where(col <= row, 0.0, -1e30).astype(jnp.float32)

    # Positional encoding broadcast over batch, computed once, reused twice.
    pe_m = jnp.broadcast_to(pe_ref[...][None], (B, S, D)).reshape(M, D)

    # input_linear + time embeddings + positional encoding, fused.
    in_w = W(D_IN, D)
    in_b = V(D)
    h = mm(feats_ref[...], in_w) + in_b + extra_ref[...] + pe_m

    # --------------------------- encoder stack -----------------------------
    enc = h
    for _ in range(num_enc):
        wqkv = W(D, 3 * D); wo = W(D, D); w1 = W(D, DFF); w2 = W(DFF, D)
        bqkv = V(3 * D); bo = V(D); g1 = V(D); bb1 = V(D)
        b1 = V(DFF); b2 = V(D); g2 = V(D); bb2 = V(D)

        qkv = mm(enc, wqkv) + bqkv
        sa = attend(qkv[:, :D], qkv[:, D:2 * D], qkv[:, 2 * D:], wo, bo, None)
        x1 = layernorm(enc + sa, g1, bb1)
        enc = layernorm(x1 + ffn(x1, w1, b1, w2, b2), g2, bb2)

    # --------------------------- decoder stack -----------------------------
    dec = enc + pe_m                          # tgt = pos_encoder(input_encode)
    for _ in range(num_dec):
        sa_wqkv = W(D, 3 * D); sa_wo = W(D, D)
        ca_wq = W(D, D); ca_wkv = W(D, 2 * D); ca_wo = W(D, D)
        w1 = W(D, DFF); w2 = W(DFF, D)
        sa_bqkv = V(3 * D); sa_bo = V(D)
        ca_bq = V(D); ca_bkv = V(2 * D); ca_bo = V(D)
        g1 = V(D); bb1 = V(D); g2 = V(D); bb2 = V(D); g3 = V(D); bb3 = V(D)
        b1 = V(DFF); b2 = V(D)

        # masked self-attention (fused QKV)
        qkv = mm(dec, sa_wqkv) + sa_bqkv
        sa = attend(qkv[:, :D], qkv[:, D:2 * D], qkv[:, 2 * D:],
                    sa_wo, sa_bo, causal)
        x1 = layernorm(dec + sa, g1, bb1)

        # cross-attention against the encoder memory (fused KV projection)
        q = mm(x1, ca_wq) + ca_bq
        kv = mm(enc, ca_wkv) + ca_bkv
        ca = attend(q, kv[:, :D], kv[:, D:], ca_wo, ca_bo, None)
        x2 = layernorm(x1 + ca, g2, bb2)

        dec = layernorm(x2 + ffn(x2, w1, b1, w2, b2), g3, bb3)

    # ------------------ output linear (lane-dense, padded) -----------------
    out_w = W(D, NPAD)
    out_b = V(NPAD)
    out_ref[...] = mm(dec, out_w) + out_b


# ----------------------------------------------------------------------------
# Forward wrapper: embedding gathers, slab packing, one pallas_call
# ----------------------------------------------------------------------------

def _pad2d(a, rows, cols):
    return jnp.pad(a, ((0, rows - a.shape[0]), (0, cols - a.shape[1])))


def transformer1d_forward(params, x, *, nhead):
    B, S, _ = x.shape
    d_input, d_model = params["input_w"].shape
    dff = params["enc_layers"][0]["w1"].shape[1]
    num_enc = len(params["enc_layers"])
    num_dec = len(params["dec_layers"])

    month_idx = x[:, :, -2].astype(jnp.int32)
    day_idx = x[:, :, -1].astype(jnp.int32)
    feats = x[:, :, :-2].reshape(B * S, d_input)

    # TODO(synk): TimeEmbedding index gathers have no clean Pallas equivalent at
    # this size; done with jnp.take here and the additions fused into the kernel.
    m_emb = jnp.take(params["month_emb"], month_idx, axis=0)
    d_emb = jnp.take(params["day_emb"], day_idx, axis=0)
    extra = (m_emb + d_emb).reshape(B * S, d_model)          # (M, D), pe added in-kernel
    pe = params["pe"][0, :S, :]                              # (S, D), broadcast in-kernel

    # ---- pack all weights into one bf16 slab and all vectors into one f32 slab
    # (fewer/larger DMAs; tiny packing ops are cheap XLA work — hoist/cache
    # outside jit if this wrapper is called in a hot loop).
    n_out_pad = 128                                          # lane-dense output width
    rmax = max(d_input, d_model, dff)
    cmax = max(n_out_pad, 3 * d_model, dff, d_model)

    mats = [params["input_w"]]
    vecs = [params["input_b"]]
    for lp in params["enc_layers"]:
        mats += [lp[k] for k in ENC_MAT_KEYS]
        vecs += [lp[k] for k in ENC_VEC_KEYS]
    for lp in params["dec_layers"]:
        mats += [lp[k] for k in DEC_MAT_KEYS]
        vecs += [lp[k] for k in DEC_VEC_KEYS]
    mats += [params["output_w"]]
    vecs += [params["output_b"]]

    w_slab = jnp.stack([_pad2d(m, rmax, cmax) for m in mats]).astype(jnp.bfloat16)
    v_slab = jnp.concatenate([_pad2d(v, 1, cmax)[:, :128] if cmax == 128
                              else _pad2d(v, 1, cmax) for v in vecs], axis=0)
    v_slab = v_slab[:, :cmax].astype(jnp.float32)

    vmem_spec = pl.BlockSpec(memory_space=pltpu.MemorySpace.VMEM)
    out_pad = pl.pallas_call(
        functools.partial(
            _fused_forward_kernel, B=B, S=S, D=d_model, H=nhead,
            DFF=dff, D_IN=d_input, num_enc=num_enc, num_dec=num_dec),
        out_shape=jax.ShapeDtypeStruct((B * S, n_out_pad), jnp.float32),
        in_specs=[vmem_spec] * 5,
        out_specs=vmem_spec,
        compiler_params=pltpu.CompilerParams(vmem_limit_bytes=32 * 1024 * 1024),
    )(feats, extra, pe, v_slab, w_slab)

    return out_pad[:, :d_input].reshape(B, S, d_input)


# ----------------------------------------------------------------------------
# Deterministic parameter init (shapes follow the PyTorch module; QKV pre-fused)
# ----------------------------------------------------------------------------

def _init_linear(key, fan_in, fan_out):
    k1, k2 = jax.random.split(key)
    bound = 1.0 / math.sqrt(fan_in)
    w = jax.random.uniform(k1, (fan_in, fan_out), jnp.float32, -bound, bound)
    b = jax.random.uniform(k2, (1, fan_out), jnp.float32, -bound, bound)
    return w, b


def positional_encoding(max_len, d_model):
    pos = jnp.arange(max_len, dtype=jnp.float32)[:, None]
    div = jnp.exp(jnp.arange(0, d_model, 2, dtype=jnp.float32) *
                  (-math.log(10000.0) / d_model))
    pe = jnp.zeros((max_len, d_model), jnp.float32)
    pe = pe.at[:, 0::2].set(jnp.sin(pos * div))
    pe = pe.at[:, 1::2].set(jnp.cos(pos * div))
    return pe[None]  # (1, max_len, d_model)


def init_params(key, d_input, d_model, dff, num_enc, num_dec, max_len):
    keys = iter(jax.random.split(key, 256))
    nxt = lambda: next(keys)
    lin = lambda fi, fo: _init_linear(nxt(), fi, fo)

    def ln():
        return (jnp.ones((1, d_model), jnp.float32),
                jnp.zeros((1, d_model), jnp.float32))

    def qkv_fused():
        wq, bq = lin(d_model, d_model)
        wk, bk = lin(d_model, d_model)
        wv, bv = lin(d_model, d_model)
        return (jnp.concatenate([wq, wk, wv], axis=1),
                jnp.concatenate([bq, bk, bv], axis=1))

    def enc_layer():
        wqkv, bqkv = qkv_fused()
        wo, bo = lin(d_model, d_model)
        w1, b1 = lin(d_model, dff)
        w2, b2 = lin(dff, d_model)
        g1, bb1 = ln(); g2, bb2 = ln()
        return dict(wqkv=wqkv, bqkv=bqkv, wo=wo, bo=bo,
                    ln1_g=g1, ln1_b=bb1, w1=w1, b1=b1, w2=w2, b2=b2,
                    ln2_g=g2, ln2_b=bb2)

    def dec_layer():
        sa_wqkv, sa_bqkv = qkv_fused()
        sa_wo, sa_bo = lin(d_model, d_model)
        ca_wq, ca_bq = lin(d_model, d_model)
        wk, bk = lin(d_model, d_model)
        wv, bv = lin(d_model, d_model)
        ca_wkv = jnp.concatenate([wk, wv], axis=1)
        ca_bkv = jnp.concatenate([bk, bv], axis=1)
        ca_wo, ca_bo = lin(d_model, d_model)
        w1, b1 = lin(d_model, dff)
        w2, b2 = lin(dff, d_model)
        g1, bb1 = ln(); g2, bb2 = ln(); g3, bb3 = ln()
        return dict(sa_wqkv=sa_wqkv, sa_bqkv=sa_bqkv, sa_wo=sa_wo, sa_bo=sa_bo,
                    ca_wq=ca_wq, ca_bq=ca_bq, ca_wkv=ca_wkv, ca_bkv=ca_bkv,
                    ca_wo=ca_wo, ca_bo=ca_bo,
                    ln1_g=g1, ln1_b=bb1, ln2_g=g2, ln2_b=bb2, ln3_g=g3, ln3_b=bb3,
                    w1=w1, b1=b1, w2=w2, b2=b2)

    input_w, input_b = lin(d_input, d_model)
    output_w, output_b = lin(d_model, d_input)
    month_emb = 0.02 * jax.random.normal(nxt(), (13, d_model), jnp.float32)
    day_emb = 0.02 * jax.random.normal(nxt(), (32, d_model), jnp.float32)

    return dict(
        input_w=input_w, input_b=input_b,
        output_w=output_w, output_b=output_b,
        month_emb=month_emb, day_emb=day_emb,
        pe=positional_encoding(max_len, d_model),
        enc_layers=[enc_layer() for _ in range(num_enc)],
        dec_layers=[dec_layer() for _ in range(num_dec)],
    )


# ----------------------------------------------------------------------------

if __name__ == "__main__":
    B, S = 2, 8                     # batch, input_length
    d_input, d_model = 6, 32
    nhead, dff = 2, 64
    num_enc, num_dec = 1, 1

    key = jax.random.PRNGKey(0)
    kf, km, kd, kp = jax.random.split(key, 4)
    feats = jax.random.normal(kf, (B, S, d_input), jnp.float32)
    months = jax.random.randint(km, (B, S, 1), 1, 13).astype(jnp.float32)
    days = jax.random.randint(kd, (B, S, 1), 1, 32).astype(jnp.float32)
    # last two feature columns carry month / day indices, as in the PyTorch module
    x = jnp.concatenate([feats, months, days], axis=-1)       # (B, S, d_input + 2)

    params = init_params(kp, d_input, d_model, dff, num_enc, num_dec, max_len=64)

    fwd = jax.jit(functools.partial(transformer1d_forward, nhead=nhead))
    out = jax.block_until_ready(fwd(params, x))
    assert out.shape == (B, S, d_input), out.shape
    assert bool(jnp.all(jnp.isfinite(out)))
    print("KERNEL_OK")
</pallas_src>

<mosaic_0001>
module attributes {stable_mosaic.version = 11 : i64} {
  func.func @_fused_forward_kernel(%arg0: memref<16x6xf32, #tpu.memory_space<vmem>>, %arg1: memref<16x32xf32, #tpu.memory_space<vmem>>, %arg2: memref<8x32xf32, #tpu.memory_space<vmem>>, %arg3: memref<23x128xf32, #tpu.memory_space<vmem>>, %arg4: memref<13x64x128xbf16, #tpu.memory_space<vmem>>, %arg5: memref<16x128xf32, #tpu.memory_space<vmem>>) attributes {dimension_semantics = [], scalar_prefetch = 0 : i64, scratch_operands = 0 : i64, tpu.core_type = #tpu.core_type<tc>} {
    %0 = tpu.iota {dimensions = array<i32: 0>} : vector<8x8xi32>
    %1 = tpu.iota {dimensions = array<i32: 1>} : vector<8x8xi32>
    %2 = arith.cmpi sle, %1, %0 : vector<8x8xi32>
    %cst = arith.constant 0.000000e+00 : f32
    %cst_0 = arith.constant -1.000000e+30 : f32
    %3 = vector.broadcast %cst : f32 to vector<8x8xf32>
    %4 = vector.broadcast %cst_0 : f32 to vector<8x8xf32>
    %5 = arith.select %2, %3, %4 : vector<8x8xi1>, vector<8x8xf32>
    %c0 = arith.constant 0 : index
    %c0_1 = arith.constant 0 : index
    %6 = vector.load %arg2[%c0, %c0_1] : memref<8x32xf32, #tpu.memory_space<vmem>>, vector<8x32xf32>
    %7 = vector.shape_cast %6 : vector<8x32xf32> to vector<1x8x32xf32>
    %8 = vector.shape_cast %7 : vector<1x8x32xf32> to vector<1x8x32xf32>
    %9 = vector.broadcast %8 : vector<1x8x32xf32> to vector<2x8x32xf32>
    %10 = vector.shape_cast %9 : vector<2x8x32xf32> to vector<16x32xf32>
    %c0_2 = arith.constant 0 : index
    %c0_3 = arith.constant 0 : index
    %c0_4 = arith.constant 0 : index
    %11 = vector.load %arg4[%c0_2, %c0_3, %c0_4] : memref<13x64x128xbf16, #tpu.memory_space<vmem>>, vector<1x6x32xbf16>
    %12 = vector.shape_cast %11 : vector<1x6x32xbf16> to vector<6x32xbf16>
    %c0_5 = arith.constant 0 : index
    %c0_6 = arith.constant 0 : index
    %13 = vector.load %arg3[%c0_5, %c0_6] : memref<23x128xf32, #tpu.memory_space<vmem>>, vector<1x32xf32>
    %c0_7 = arith.constant 0 : index
    %c0_8 = arith.constant 0 : index
    %14 = vector.load %arg0[%c0_7, %c0_8] : memref<16x6xf32, #tpu.memory_space<vmem>>, vector<16x6xf32>
    %15 = arith.truncf %14 : vector<16x6xf32> to vector<16x6xbf16>
    %cst_9 = arith.constant dense<0.000000e+00> : vector<16x32xf32>
    %16 = tpu.matmul %15, %12, %cst_9 {dimension_numbers = #tpu.dot_dimension_numbers<[1], [0], [0], [1], [0, 0, 1, 1], [], []>} : vector<16x6xbf16>, vector<6x32xbf16>, vector<16x32xf32> -> vector<16x32xf32>
    %17 = vector.broadcast %13 : vector<1x32xf32> to vector<16x32xf32>
    %18 = arith.addf %16, %17 : vector<16x32xf32>
    %c0_10 = arith.constant 0 : index
    %c0_11 = arith.constant 0 : index
    %19 = vector.load %arg1[%c0_10, %c0_11] : memref<16x32xf32, #tpu.memory_space<vmem>>, vector<16x32xf32>
    %20 = arith.addf %18, %19 : vector<16x32xf32>
    %21 = arith.addf %20, %10 : vector<16x32xf32>
    %c1 = arith.constant 1 : index
    %c0_12 = arith.constant 0 : index
    %c0_13 = arith.constant 0 : index
    %22 = vector.load %arg4[%c1, %c0_12, %c0_13] : memref<13x64x128xbf16, #tpu.memory_space<vmem>>, vector<1x32x96xbf16>
    %23 = vector.shape_cast %22 : vector<1x32x96xbf16> to vector<32x96xbf16>
    %c2 = arith.constant 2 : index
    %c0_14 = arith.constant 0 : index
    %c0_15 = arith.constant 0 : index
    %24 = vector.load %arg4[%c2, %c0_14, %c0_15] : memref<13x64x128xbf16, #tpu.memory_space<vmem>>, vector<1x32x32xbf16>
    %25 = vector.shape_cast %24 : vector<1x32x32xbf16> to vector<32x32xbf16>
    %c3 = arith.constant 3 : index
    %c0_16 = arith.constant 0 : index
    %c0_17 = arith.constant 0 : index
    %26 = vector.load %arg4[%c3, %c0_16, %c0_17] : memref<13x64x128xbf16, #tpu.memory_space<vmem>>, vector<1x32x64xbf16>
    %27 = vector.shape_cast %26 : vector<1x32x64xbf16> to vector<32x64xbf16>
    %c4 = arith.constant 4 : index
    %c0_18 = arith.constant 0 : index
    %c0_19 = arith.constant 0 : index
    %28 = vector.load %arg4[%c4, %c0_18, %c0_19] : memref<13x64x128xbf16, #tpu.memory_space<vmem>>, vector<1x64x32xbf16>
    %29 = vector.shape_cast %28 : vector<1x64x32xbf16> to vector<64x32xbf16>
    %c1_20 = arith.constant 1 : index
    %c0_21 = arith.constant 0 : index
    %30 = vector.load %arg3[%c1_20, %c0_21] : memref<23x128xf32, #tpu.memory_space<vmem>>, vector<1x96xf32>
    %c2_22 = arith.constant 2 : index
    %c0_23 = arith.constant 0 : index
    %31 = vector.load %arg3[%c2_22, %c0_23] : memref<23x128xf32, #tpu.memory_space<vmem>>, vector<1x32xf32>
    %c3_24 = arith.constant 3 : index
    %c0_25 = arith.constant 0 : index
    %32 = vector.load %arg3[%c3_24, %c0_25] : memref<23x128xf32, #tpu.memory_space<vmem>>, vector<1x32xf32>
    %c4_26 = arith.constant 4 : index
    %c0_27 = arith.constant 0 : index
    %33 = vector.load %arg3[%c4_26, %c0_27] : memref<23x128xf32, #tpu.memory_space<vmem>>, vector<1x32xf32>
    %c5 = arith.constant 5 : index
    %c0_28 = arith.constant 0 : index
    %34 = vector.load %arg3[%c5, %c0_28] : memref<23x128xf32, #tpu.memory_space<vmem>>, vector<1x64xf32>
    %c6 = arith.constant 6 : index
    %c0_29 = arith.constant 0 : index
    %35 = vector.load %arg3[%c6, %c0_29] : memref<23x128xf32, #tpu.memory_space<vmem>>, vector<1x32xf32>
    %c7 = arith.constant 7 : index
    %c0_30 = arith.constant 0 : index
    %36 = vector.load %arg3[%c7, %c0_30] : memref<23x128xf32, #tpu.memory_space<vmem>>, vector<1x32xf32>
    %c8 = arith.constant 8 : index
    %c0_31 = arith.constant 0 : index
    %37 = vector.load %arg3[%c8, %c0_31] : memref<23x128xf32, #tpu.memory_space<vmem>>, vector<1x32xf32>
    %38 = arith.truncf %21 : vector<16x32xf32> to vector<16x32xbf16>
    %cst_32 = arith.constant dense<0.000000e+00> : vector<16x96xf32>
    %39 = tpu.matmul %38, %23, %cst_32 {dimension_numbers = #tpu.dot_dimension_numbers<[1], [0], [0], [1], [0, 0, 1, 1], [], []>} : vector<16x32xbf16>, vector<32x96xbf16>, vector<16x96xf32> -> vector<16x96xf32>
    %40 = vector.broadcast %30 : vector<1x96xf32> to vector<16x96xf32>
    %41 = arith.addf %39, %40 : vector<16x96xf32>
    %42 = vector.extract_strided_slice %41 {offsets = [0, 0], sizes = [16, 32], strides = [1, 1]} : vector<16x96xf32> to vector<16x32xf32>
    %43 = vector.extract_strided_slice %41 {offsets = [0, 32], sizes = [16, 32], strides = [1, 1]} : vector<16x96xf32> to vector<16x32xf32>
    %44 = vector.extract_strided_slice %41 {offsets = [0, 64], sizes = [16, 32], strides = [1, 1]} : vector<16x96xf32> to vector<16x32xf32>
    %45 = vector.extract_strided_slice %42 {offsets = [0, 0], sizes = [16, 16], strides = [1, 1]} : vector<16x32xf32> to vector<16x16xf32>
    %46 = vector.shape_cast %45 : vector<16x16xf32> to vector<2x8x16xf32>
    %47 = arith.truncf %46 : vector<2x8x16xf32> to vector<2x8x16xbf16>
    %48 = vector.extract_strided_slice %43 {offsets = [0, 0], sizes = [16, 16], strides = [1, 1]} : vector<16x32xf32> to vector<16x16xf32>
    %49 = vector.shape_cast %48 : vector<16x16xf32> to vector<2x8x16xf32>
    %50 = arith.truncf %49 : vector<2x8x16xf32> to vector<2x8x16xbf16>
    %51 = vector.extract_strided_slice %44 {offsets = [0, 0], sizes = [16, 16], strides = [1, 1]} : vector<16x32xf32> to vector<16x16xf32>
    %52 = vector.shape_cast %51 : vector<16x16xf32> to vector<2x8x16xf32>
    %53 = arith.truncf %52 : vector<2x8x16xf32> to vector<2x8x16xbf16>
    "tpu.trace_start"() <{level = 10 : i32, message = "bqd,bkd->bqk"}> : () -> ()
    %cst_33 = arith.constant dense<0.000000e+00> : vector<2x8x8xf32>
    %54 = tpu.matmul %47, %50, %cst_33 {dimension_numbers = #tpu.dot_dimension_numbers<[2], [2], [1], [1], [0, 0, 0, 1, 1, 1], [0], [0]>} : vector<2x8x16xbf16>, vector<2x8x16xbf16>, vector<2x8x8xf32> -> vector<2x8x8xf32>
    "tpu.trace_stop"() : () -> ()
    %cst_34 = arith.constant 2.500000e-01 : f32
    %55 = vector.broadcast %cst_34 : f32 to vector<2x8x8xf32>
    %56 = arith.mulf %54, %55 : vector<2x8x8xf32>
    %cst_35 = arith.constant dense<0xFF800000> : vector<2x8xf32>
    %57 = vector.multi_reduction <maximumf>, %56, %cst_35 [2] : vector<2x8x8xf32> to vector<2x8xf32>
    %58 = vector.shape_cast %57 : vector<2x8xf32> to vector<2x8x1xf32>
    %59 = vector.broadcast %58 : vector<2x8x1xf32> to vector<2x8x8xf32>
    %60 = arith.subf %56, %59 : vector<2x8x8xf32>
    %61 = math.exp %60 : vector<2x8x8xf32>
    %cst_36 = arith.constant dense<0.000000e+00> : vector<2x8xf32>
    %62 = vector.multi_reduction <add>, %61, %cst_36 [2] : vector<2x8x8xf32> to vector<2x8xf32>
    %63 = vector.shape_cast %62 : vector<2x8xf32> to vector<2x8x1xf32>
    %64 = tpu.reciprocal %63 {approx = true} : vector<2x8x1xf32> -> vector<2x8x1xf32>
    %65 = vector.broadcast %64 : vector<2x8x1xf32> to vector<2x8x8xf32>
    %66 = arith.mulf %61, %65 : vector<2x8x8xf32>
    %67 = arith.truncf %66 : vector<2x8x8xf32> to vector<2x8x8xbf16>
    "tpu.trace_start"() <{level = 10 : i32, message = "bqk,bkd->bqd"}> : () -> ()
    %cst_37 = arith.constant dense<0.000000e+00> : vector<2x8x16xf32>
    %68 = tpu.matmul %67, %53, %cst_37 {dimension_numbers = #tpu.dot_dimension_numbers<[2], [1], [1], [2], [0, 0, 0, 1, 1, 2], [0], [0]>} : vector<2x8x8xbf16>, vector<2x8x16xbf16>, vector<2x8x16xf32> -> vector<2x8x16xf32>
    "tpu.trace_stop"() : () -> ()
    %69 = vector.shape_cast %68 : vector<2x8x16xf32> to vector<16x16xf32>
    %70 = vector.extract_strided_slice %42 {offsets = [0, 16], sizes = [16, 16], strides = [1, 1]} : vector<16x32xf32> to vector<16x16xf32>
    %71 = vector.shape_cast %70 : vector<16x16xf32> to vector<2x8x16xf32>
    %72 = arith.truncf %71 : vector<2x8x16xf32> to vector<2x8x16xbf16>
    %73 = vector.extract_strided_slice %43 {offsets = [0, 16], sizes = [16, 16], strides = [1, 1]} : vector<16x32xf32> to vector<16x16xf32>
    %74 = vector.shape_cast %73 : vector<16x16xf32> to vector<2x8x16xf32>
    %75 = arith.truncf %74 : vector<2x8x16xf32> to vector<2x8x16xbf16>
    %76 = vector.extract_strided_slice %44 {offsets = [0, 16], sizes = [16, 16], strides = [1, 1]} : vector<16x32xf32> to vector<16x16xf32>
    %77 = vector.shape_cast %76 : vector<16x16xf32> to vector<2x8x16xf32>
    %78 = arith.truncf %77 : vector<2x8x16xf32> to vector<2x8x16xbf16>
    "tpu.trace_start"() <{level = 10 : i32, message = "bqd,bkd->bqk"}> : () -> ()
    %cst_38 = arith.constant dense<0.000000e+00> : vector<2x8x8xf32>
    %79 = tpu.matmul %72, %75, %cst_38 {dimension_numbers = #tpu.dot_dimension_numbers<[2], [2], [1], [1], [0, 0, 0, 1, 1, 1], [0], [0]>} : vector<2x8x16xbf16>, vector<2x8x16xbf16>, vector<2x8x8xf32> -> vector<2x8x8xf32>
    "tpu.trace_stop"() : () -> ()
    %cst_39 = arith.constant 2.500000e-01 : f32
    %80 = vector.broadcast %cst_39 : f32 to vector<2x8x8xf32>
    %81 = arith.mulf %79, %80 : vector<2x8x8xf32>
    %cst_40 = arith.constant dense<0xFF800000> : vector<2x8xf32>
    %82 = vector.multi_reduction <maximumf>, %81, %cst_40 [2] : vector<2x8x8xf32> to vector<2x8xf32>
    %83 = vector.shape_cast %82 : vector<2x8xf32> to vector<2x8x1xf32>
    %84 = vector.broadcast %83 : vector<2x8x1xf32> to vector<2x8x8xf32>
    %85 = arith.subf %81, %84 : vector<2x8x8xf32>
    %86 = math.exp %85 : vector<2x8x8xf32>
    %cst_41 = arith.constant dense<0.000000e+00> : vector<2x8xf32>
    %87 = vector.multi_reduction <add>, %86, %cst_41 [2] : vector<2x8x8xf32> to vector<2x8xf32>
    %88 = vector.shape_cast %87 : vector<2x8xf32> to vector<2x8x1xf32>
    %89 = tpu.reciprocal %88 {approx = true} : vector<2x8x1xf32> -> vector<2x8x1xf32>
    %90 = vector.broadcast %89 : vector<2x8x1xf32> to vector<2x8x8xf32>
    %91 = arith.mulf %86, %90 : vector<2x8x8xf32>
    %92 = arith.truncf %91 : vector<2x8x8xf32> to vector<2x8x8xbf16>
    "tpu.trace_start"() <{level = 10 : i32, message = "bqk,bkd->bqd"}> : () -> ()
    %cst_42 = arith.constant dense<0.000000e+00> : vector<2x8x16xf32>
    %93 = tpu.matmul %92, %78, %cst_42 {dimension_numbers = #tpu.dot_dimension_numbers<[2], [1], [1], [2], [0, 0, 0, 1, 1, 2], [0], [0]>} : vector<2x8x8xbf16>, vector<2x8x16xbf16>, vector<2x8x16xf32> -> vector<2x8x16xf32>
    "tpu.trace_stop"() : () -> ()
    %94 = vector.shape_cast %93 : vector<2x8x16xf32> to vector<16x16xf32>
    %95 = tpu.concatenate %69, %94 in 1 : vector<16x16xf32>, vector<16x16xf32> -> vector<16x32xf32>
    %96 = arith.truncf %95 : vector<16x32xf32> to vector<16x32xbf16>
    %cst_43 = arith.constant dense<0.000000e+00> : vector<16x32xf32>
    %97 = tpu.matmul %96, %25, %cst_43 {dimension_numbers = #tpu.dot_dimension_numbers<[1], [0], [0], [1], [0, 0, 1, 1], [], []>} : vector<16x32xbf16>, vector<32x32xbf16>, vector<16x32xf32> -> vector<16x32xf32>
    %98 = vector.broadcast %31 : vector<1x32xf32> to vector<16x32xf32>
    %99 = arith.addf %97, %98 : vector<16x32xf32>
    %100 = arith.addf %21, %99 : vector<16x32xf32>
    %cst_44 = arith.constant dense<0.000000e+00> : vector<16xf32>
    %101 = vector.multi_reduction <add>, %100, %cst_44 [1] : vector<16x32xf32> to vector<16xf32>
    %102 = vector.shape_cast %101 : vector<16xf32> to vector<16x1xf32>
    %cst_45 = arith.constant 3.200000e+01 : f32
    %103 = vector.broadcast %cst_45 : f32 to vector<16x1xf32>
    %104 = arith.divf %102, %103 : vector<16x1xf32>
    %105 = vector.broadcast %104 : vector<16x1xf32> to vector<16x32xf32>
    %106 = arith.subf %100, %105 : vector<16x32xf32>
    %107 = arith.mulf %106, %106 : vector<16x32xf32>
    %cst_46 = arith.constant dense<0.000000e+00> : vector<16xf32>
    %108 = vector.multi_reduction <add>, %107, %cst_46 [1] : vector<16x32xf32> to vector<16xf32>
    %109 = vector.shape_cast %108 : vector<16xf32> to vector<16x1xf32>
    %cst_47 = arith.constant 3.200000e+01 : f32
    %110 = vector.broadcast %cst_47 : f32 to vector<16x1xf32>
    %111 = arith.divf %109, %110 : vector<16x1xf32>
    %cst_48 = arith.constant 9.99999974E-6 : f32
    %112 = vector.broadcast %cst_48 : f32 to vector<16x1xf32>
    %113 = arith.addf %111, %112 : vector<16x1xf32>
    %114 = math.rsqrt %113 : vector<16x1xf32>
    %115 = vector.broadcast %114 : vector<16x1xf32> to vector<16x32xf32>
    %116 = arith.mulf %106, %115 : vector<16x32xf32>
    %117 = vector.broadcast %32 : vector<1x32xf32> to vector<16x32xf32>
    %118 = arith.mulf %116, %117 : vector<16x32xf32>
    %119 = vector.broadcast %33 : vector<1x32xf32> to vector<16x32xf32>
    %120 = arith.addf %118, %119 : vector<16x32xf32>
    %121 = arith.truncf %120 : vector<16x32xf32> to vector<16x32xbf16>
    %cst_49 = arith.constant dense<0.000000e+00> : vector<16x64xf32>
    %122 = tpu.matmul %121, %27, %cst_49 {dimension_numbers = #tpu.dot_dimension_numbers<[1], [0], [0], [1], [0, 0, 1, 1], [], []>} : vector<16x32xbf16>, vector<32x64xbf16>, vector<16x64xf32> -> vector<16x64xf32>
    %123 = vector.broadcast %34 : vector<1x64xf32> to vector<16x64xf32>
    %124 = arith.addf %122, %123 : vector<16x64xf32>
    %cst_50 = arith.constant 0.000000e+00 : f32
    %125 = vector.broadcast %cst_50 : f32 to vector<16x64xf32>
    %126 = arith.maximumf %124, %125 : vector<16x64xf32>
    %127 = arith.truncf %126 : vector<16x64xf32> to vector<16x64xbf16>
    %cst_51 = arith.constant dense<0.000000e+00> : vector<16x32xf32>
    %128 = tpu.matmul %127, %29, %cst_51 {dimension_numbers = #tpu.dot_dimension_numbers<[1], [0], [0], [1], [0, 0, 1, 1], [], []>} : vector<16x64xbf16>, vector<64x32xbf16>, vector<16x32xf32> -> vector<16x32xf32>
    %129 = vector.broadcast %35 : vector<1x32xf32> to vector<16x32xf32>
    %130 = arith.addf %128, %129 : vector<16x32xf32>
    %131 = arith.addf %120, %130 : vector<16x32xf32>
    %cst_52 = arith.constant dense<0.000000e+00> : vector<16xf32>
    %132 = vector.multi_reduction <add>, %131, %cst_52 [1] : vector<16x32xf32> to vector<16xf32>
    %133 = vector.shape_cast %132 : vector<16xf32> to vector<16x1xf32>
    %cst_53 = arith.constant 3.200000e+01 : f32
    %134 = vector.broadcast %cst_53 : f32 to vector<16x1xf32>
    %135 = arith.divf %133, %134 : vector<16x1xf32>
    %136 = vector.broadcast %135 : vector<16x1xf32> to vector<16x32xf32>
    %137 = arith.subf %131, %136 : vector<16x32xf32>
    %138 = arith.mulf %137, %137 : vector<16x32xf32>
    %cst_54 = arith.constant dense<0.000000e+00> : vector<16xf32>
    %139 = vector.multi_reduction <add>, %138, %cst_54 [1] : vector<16x32xf32> to vector<16xf32>
    %140 = vector.shape_cast %139 : vector<16xf32> to vector<16x1xf32>
    %cst_55 = arith.constant 3.200000e+01 : f32
    %141 = vector.broadcast %cst_55 : f32 to vector<16x1xf32>
    %142 = arith.divf %140, %141 : vector<16x1xf32>
    %cst_56 = arith.constant 9.99999974E-6 : f32
    %143 = vector.broadcast %cst_56 : f32 to vector<16x1xf32>
    %144 = arith.addf %142, %143 : vector<16x1xf32>
    %145 = math.rsqrt %144 : vector<16x1xf32>
    %146 = vector.broadcast %145 : vector<16x1xf32> to vector<16x32xf32>
    %147 = arith.mulf %137, %146 : vector<16x32xf32>
    %148 = vector.broadcast %36 : vector<1x32xf32> to vector<16x32xf32>
    %149 = arith.mulf %147, %148 : vector<16x32xf32>
    %150 = vector.broadcast %37 : vector<1x32xf32> to vector<16x32xf32>
    %151 = arith.addf %149, %150 : vector<16x32xf32>
    %152 = arith.addf %151, %10 : vector<16x32xf32>
    %c5_57 = arith.constant 5 : index
    %c0_58 = arith.constant 0 : index
    %c0_59 = arith.constant 0 : index
    %153 = vector.load %arg4[%c5_57, %c0_58, %c0_59] : memref<13x64x128xbf16, #tpu.memory_space<vmem>>, vector<1x32x96xbf16>
    %154 = vector.shape_cast %153 : vector<1x32x96xbf16> to vector<32x96xbf16>
    %c6_60 = arith.constant 6 : index
    %c0_61 = arith.constant 0 : index
    %c0_62 = arith.constant 0 : index
    %155 = vector.load %arg4[%c6_60, %c0_61, %c0_62] : memref<13x64x128xbf16, #tpu.memory_space<vmem>>, vector<1x32x32xbf16>
    %156 = vector.shape_cast %155 : vector<1x32x32xbf16> to vector<32x32xbf16>
    %c7_63 = arith.constant 7 : index
    %c0_64 = arith.constant 0 : index
    %c0_65 = arith.constant 0 : index
    %157 = vector.load %arg4[%c7_63, %c0_64, %c0_65] : memref<13x64x128xbf16, #tpu.memory_space<vmem>>, vector<1x32x32xbf16>
    %158 = vector.shape_cast %157 : vector<1x32x32xbf16> to vector<32x32xbf16>
    %c8_66 = arith.constant 8 : index
    %c0_67 = arith.constant 0 : index
    %c0_68 = arith.constant 0 : index
    %159 = vector.load %arg4[%c8_66, %c0_67, %c0_68] : memref<13x64x128xbf16, #tpu.memory_space<vmem>>, vector<1x32x64xbf16>
    %160 = vector.shape_cast %159 : vector<1x32x64xbf16> to vector<32x64xbf16>
    %c9 = arith.constant 9 : index
    %c0_69 = arith.constant 0 : index
    %c0_70 = arith.constant 0 : index
    %161 = vector.load %arg4[%c9, %c0_69, %c0_70] : memref<13x64x128xbf16, #tpu.memory_space<vmem>>, vector<1x32x32xbf16>
    %162 = vector.shape_cast %161 : vector<1x32x32xbf16> to vector<32x32xbf16>
    %c10 = arith.constant 10 : index
    %c0_71 = arith.constant 0 : index
    %c0_72 = arith.constant 0 : index
    %163 = vector.load %arg4[%c10, %c0_71, %c0_72] : memref<13x64x128xbf16, #tpu.memory_space<vmem>>, vector<1x32x64xbf16>
    %164 = vector.shape_cast %163 : vector<1x32x64xbf16> to vector<32x64xbf16>
    %c11 = arith.constant 11 : index
    %c0_73 = arith.constant 0 : index
    %c0_74 = arith.constant 0 : index
    %165 = vector.load %arg4[%c11, %c0_73, %c0_74] : memref<13x64x128xbf16, #tpu.memory_space<vmem>>, vector<1x64x32xbf16>
    %166 = vector.shape_cast %165 : vector<1x64x32xbf16> to vector<64x32xbf16>
    %c9_75 = arith.constant 9 : index
    %c0_76 = arith.constant 0 : index
    %167 = vector.load %arg3[%c9_75, %c0_76] : memref<23x128xf32, #tpu.memory_space<vmem>>, vector<1x96xf32>
    %c10_77 = arith.constant 10 : index
    %c0_78 = arith.constant 0 : index
    %168 = vector.load %arg3[%c10_77, %c0_78] : memref<23x128xf32, #tpu.memory_space<vmem>>, vector<1x32xf32>
    %c11_79 = arith.constant 11 : index
    %c0_80 = arith.constant 0 : index
    %169 = vector.load %arg3[%c11_79, %c0_80] : memref<23x128xf32, #tpu.memory_space<vmem>>, vector<1x32xf32>
    %c12 = arith.constant 12 : index
    %c0_81 = arith.constant 0 : index
    %170 = vector.load %arg3[%c12, %c0_81] : memref<23x128xf32, #tpu.memory_space<vmem>>, vector<1x64xf32>
    %c13 = arith.constant 13 : index
    %c0_82 = arith.constant 0 : index
    %171 = vector.load %arg3[%c13, %c0_82] : memref<23x128xf32, #tpu.memory_space<vmem>>, vector<1x32xf32>
    %c14 = arith.constant 14 : index
    %c0_83 = arith.constant 0 : index
    %172 = vector.load %arg3[%c14, %c0_83] : memref<23x128xf32, #tpu.memory_space<vmem>>, vector<1x32xf32>
    %c15 = arith.constant 15 : index
    %c0_84 = arith.constant 0 : index
    %173 = vector.load %arg3[%c15, %c0_84] : memref<23x128xf32, #tpu.memory_space<vmem>>, vector<1x32xf32>
    %c16 = arith.constant 16 : index
    %c0_85 = arith.constant 0 : index
    %174 = vector.load %arg3[%c16, %c0_85] : memref<23x128xf32, #tpu.memory_space<vmem>>, vector<1x32xf32>
    %c17 = arith.constant 17 : index
    %c0_86 = arith.constant 0 : index
    %175 = vector.load %arg3[%c17, %c0_86] : memref<23x128xf32, #tpu.memory_space<vmem>>, vector<1x32xf32>
    %c18 = arith.constant 18 : index
    %c0_87 = arith.constant 0 : index
    %176 = vector.load %arg3[%c18, %c0_87] : memref<23x128xf32, #tpu.memory_space<vmem>>, vector<1x32xf32>
    %c19 = arith.constant 19 : index
    %c0_88 = arith.constant 0 : index
    %177 = vector.load %arg3[%c19, %c0_88] : memref<23x128xf32, #tpu.memory_space<vmem>>, vector<1x32xf32>
    %c20 = arith.constant 20 : index
    %c0_89 = arith.constant 0 : index
    %178 = vector.load %arg3[%c20, %c0_89] : memref<23x128xf32, #tpu.memory_space<vmem>>, vector<1x64xf32>
    %c21 = arith.constant 21 : index
    %c0_90 = arith.constant 0 : index
    %179 = vector.load %arg3[%c21, %c0_90] : memref<23x128xf32, #tpu.memory_space<vmem>>, vector<1x32xf32>
    %180 = arith.truncf %152 : vector<16x32xf32> to vector<16x32xbf16>
    %cst_91 = arith.constant dense<0.000000e+00> : vector<16x96xf32>
    %181 = tpu.matmul %180, %154, %cst_91 {dimension_numbers = #tpu.dot_dimension_numbers<[1], [0], [0], [1], [0, 0, 1, 1], [], []>} : vector<16x32xbf16>, vector<32x96xbf16>, vector<16x96xf32> -> vector<16x96xf32>
    %182 = vector.broadcast %167 : vector<1x96xf32> to vector<16x96xf32>
    %183 = arith.addf %181, %182 : vector<16x96xf32>
    %184 = vector.extract_strided_slice %183 {offsets = [0, 0], sizes = [16, 32], strides = [1, 1]} : vector<16x96xf32> to vector<16x32xf32>
    %185 = vector.extract_strided_slice %183 {offsets = [0, 32], sizes = [16, 32], strides = [1, 1]} : vector<16x96xf32> to vector<16x32xf32>
    %186 = vector.extract_strided_slice %183 {offsets = [0, 64], sizes = [16, 32], strides = [1, 1]} : vector<16x96xf32> to vector<16x32xf32>
    %187 = vector.extract_strided_slice %184 {offsets = [0, 0], sizes = [16, 16], strides = [1, 1]} : vector<16x32xf32> to vector<16x16xf32>
    %188 = vector.shape_cast %187 : vector<16x16xf32> to vector<2x8x16xf32>
    %189 = arith.truncf %188 : vector<2x8x16xf32> to vector<2x8x16xbf16>
    %190 = vector.extract_strided_slice %185 {offsets = [0, 0], sizes = [16, 16], strides = [1, 1]} : vector<16x32xf32> to vector<16x16xf32>
    %191 = vector.shape_cast %190 : vector<16x16xf32> to vector<2x8x16xf32>
    %192 = arith.truncf %191 : vector<2x8x16xf32> to vector<2x8x16xbf16>
    %193 = vector.extract_strided_slice %186 {offsets = [0, 0], sizes = [16, 16], strides = [1, 1]} : vector<16x32xf32> to vector<16x16xf32>
    %194 = vector.shape_cast %193 : vector<16x16xf32> to vector<2x8x16xf32>
    %195 = arith.truncf %194 : vector<2x8x16xf32> to vector<2x8x16xbf16>
    "tpu.trace_start"() <{level = 10 : i32, message = "bqd,bkd->bqk"}> : () -> ()
    %cst_92 = arith.constant dense<0.000000e+00> : vector<2x8x8xf32>
    %196 = tpu.matmul %189, %192, %cst_92 {dimension_numbers = #tpu.dot_dimension_numbers<[2], [2], [1], [1], [0, 0, 0, 1, 1, 1], [0], [0]>} : vector<2x8x16xbf16>, vector<2x8x16xbf16>, vector<2x8x8xf32> -> vector<2x8x8xf32>
    "tpu.trace_stop"() : () -> ()
    %cst_93 = arith.constant 2.500000e-01 : f32
    %197 = vector.broadcast %cst_93 : f32 to vector<2x8x8xf32>
    %198 = arith.mulf %196, %197 : vector<2x8x8xf32>
    %199 = vector.shape_cast %5 : vector<8x8xf32> to vector<1x8x8xf32>
    %200 = vector.broadcast %199 : vector<1x8x8xf32> to vector<2x8x8xf32>
    %201 = arith.addf %198, %200 : vector<2x8x8xf32>
    %cst_94 = arith.constant dense<0xFF800000> : vector<2x8xf32>
    %202 = vector.multi_reduction <maximumf>, %201, %cst_94 [2] : vector<2x8x8xf32> to vector<2x8xf32>
    %203 = vector.shape_cast %202 : vector<2x8xf32> to vector<2x8x1xf32>
    %204 = vector.broadcast %203 : vector<2x8x1xf32> to vector<2x8x8xf32>
    %205 = arith.subf %201, %204 : vector<2x8x8xf32>
    %206 = math.exp %205 : vector<2x8x8xf32>
    %cst_95 = arith.constant dense<0.000000e+00> : vector<2x8xf32>
    %207 = vector.multi_reduction <add>, %206, %cst_95 [2] : vector<2x8x8xf32> to vector<2x8xf32>
    %208 = vector.shape_cast %207 : vector<2x8xf32> to vector<2x8x1xf32>
    %209 = tpu.reciprocal %208 {approx = true} : vector<2x8x1xf32> -> vector<2x8x1xf32>
    %210 = vector.broadcast %209 : vector<2x8x1xf32> to vector<2x8x8xf32>
    %211 = arith.mulf %206, %210 : vector<2x8x8xf32>
    %212 = arith.truncf %211 : vector<2x8x8xf32> to vector<2x8x8xbf16>
    "tpu.trace_start"() <{level = 10 : i32, message = "bqk,bkd->bqd"}> : () -> ()
    %cst_96 = arith.constant dense<0.000000e+00> : vector<2x8x16xf32>
    %213 = tpu.matmul %212, %195, %cst_96 {dimension_numbers = #tpu.dot_dimension_numbers<[2], [1], [1], [2], [0, 0, 0, 1, 1, 2], [0], [0]>} : vector<2x8x8xbf16>, vector<2x8x16xbf16>, vector<2x8x16xf32> -> vector<2x8x16xf32>
    "tpu.trace_stop"() : () -> ()
    %214 = vector.shape_cast %213 : vector<2x8x16xf32> to vector<16x16xf32>
    %215 = vector.extract_strided_slice %184 {offsets = [0, 16], sizes = [16, 16], strides = [1, 1]} : vector<16x32xf32> to vector<16x16xf32>
    %216 = vector.shape_cast %215 : vector<16x16xf32> to vector<2x8x16xf32>
    %217 = arith.truncf %216 : vector<2x8x16xf32> to vector<2x8x16xbf16>
    %218 = vector.extract_strided_slice %185 {offsets = [0, 16], sizes = [16, 16], strides = [1, 1]} : vector<16x32xf32> to vector<16x16xf32>
    %219 = vector.shape_cast %218 : vector<16x16xf32> to vector<2x8x16xf32>
    %220 = arith.truncf %219 : vector<2x8x16xf32> to vector<2x8x16xbf16>
    %221 = vector.extract_strided_slice %186 {offsets = [0, 16], sizes = [16, 16], strides = [1, 1]} : vector<16x32xf32> to vector<16x16xf32>
    %222 = vector.shape_cast %221 : vector<16x16xf32> to vector<2x8x16xf32>
    %223 = arith.truncf %222 : vector<2x8x16xf32> to vector<2x8x16xbf16>
    "tpu.trace_start"() <{level = 10 : i32, message = "bqd,bkd->bqk"}> : () -> ()
    %cst_97 = arith.constant dense<0.000000e+00> : vector<2x8x8xf32>
    %224 = tpu.matmul %217, %220, %cst_97 {dimension_numbers = #tpu.dot_dimension_numbers<[2], [2], [1], [1], [0, 0, 0, 1, 1, 1], [0], [0]>} : vector<2x8x16xbf16>, vector<2x8x16xbf16>, vector<2x8x8xf32> -> vector<2x8x8xf32>
    "tpu.trace_stop"() : () -> ()
    %cst_98 = arith.constant 2.500000e-01 : f32
    %225 = vector.broadcast %cst_98 : f32 to vector<2x8x8xf32>
    %226 = arith.mulf %224, %225 : vector<2x8x8xf32>
    %227 = vector.shape_cast %5 : vector<8x8xf32> to vector<1x8x8xf32>
    %228 = vector.broadcast %227 : vector<1x8x8xf32> to vector<2x8x8xf32>
    %229 = arith.addf %226, %228 : vector<2x8x8xf32>
    %cst_99 = arith.constant dense<0xFF800000> : vector<2x8xf32>
    %230 = vector.multi_reduction <maximumf>, %229, %cst_99 [2] : vector<2x8x8xf32> to vector<2x8xf32>
    %231 = vector.shape_cast %230 : vector<2x8xf32> to vector<2x8x1xf32>
    %232 = vector.broadcast %231 : vector<2x8x1xf32> to vector<2x8x8xf32>
    %233 = arith.subf %229, %232 : vector<2x8x8xf32>
    %234 = math.exp %233 : vector<2x8x8xf32>
    %cst_100 = arith.constant dense<0.000000e+00> : vector<2x8xf32>
    %235 = vector.multi_reduction <add>, %234, %cst_100 [2] : vector<2x8x8xf32> to vector<2x8xf32>
    %236 = vector.shape_cast %235 : vector<2x8xf32> to vector<2x8x1xf32>
    %237 = tpu.reciprocal %236 {approx = true} : vector<2x8x1xf32> -> vector<2x8x1xf32>
    %238 = vector.broadcast %237 : vector<2x8x1xf32> to vector<2x8x8xf32>
    %239 = arith.mulf %234, %238 : vector<2x8x8xf32>
    %240 = arith.truncf %239 : vector<2x8x8xf32> to vector<2x8x8xbf16>
    "tpu.trace_start"() <{level = 10 : i32, message = "bqk,bkd->bqd"}> : () -> ()
    %cst_101 = arith.constant dense<0.000000e+00> : vector<2x8x16xf32>
    %241 = tpu.matmul %240, %223, %cst_101 {dimension_numbers = #tpu.dot_dimension_numbers<[2], [1], [1], [2], [0, 0, 0, 1, 1, 2], [0], [0]>} : vector<2x8x8xbf16>, vector<2x8x16xbf16>, vector<2x8x16xf32> -> vector<2x8x16xf32>
    "tpu.trace_stop"() : () -> ()
    %242 = vector.shape_cast %241 : vector<2x8x16xf32> to vector<16x16xf32>
    %243 = tpu.concatenate %214, %242 in 1 : vector<16x16xf32>, vector<16x16xf32> -> vector<16x32xf32>
    %244 = arith.truncf %243 : vector<16x32xf32> to vector<16x32xbf16>
    %cst_102 = arith.constant dense<0.000000e+00> : vector<16x32xf32>
    %245 = tpu.matmul %244, %156, %cst_102 {dimension_numbers = #tpu.dot_dimension_numbers<[1], [0], [0], [1], [0, 0, 1, 1], [], []>} : vector<16x32xbf16>, vector<32x32xbf16>, vector<16x32xf32> -> vector<16x32xf32>
    %246 = vector.broadcast %168 : vector<1x32xf32> to vector<16x32xf32>
    %247 = arith.addf %245, %246 : vector<16x32xf32>
    %248 = arith.addf %152, %247 : vector<16x32xf32>
    %cst_103 = arith.constant dense<0.000000e+00> : vector<16xf32>
    %249 = vector.multi_reduction <add>, %248, %cst_103 [1] : vector<16x32xf32> to vector<16xf32>
    %250 = vector.shape_cast %249 : vector<16xf32> to vector<16x1xf32>
    %cst_104 = arith.constant 3.200000e+01 : f32
    %251 = vector.broadcast %cst_104 : f32 to vector<16x1xf32>
    %252 = arith.divf %250, %251 : vector<16x1xf32>
    %253 = vector.broadcast %252 : vector<16x1xf32> to vector<16x32xf32>
    %254 = arith.subf %248, %253 : vector<16x32xf32>
    %255 = arith.mulf %254, %254 : vector<16x32xf32>
    %cst_105 = arith.constant dense<0.000000e+00> : vector<16xf32>
    %256 = vector.multi_reduction <add>, %255, %cst_105 [1] : vector<16x32xf32> to vector<16xf32>
    %257 = vector.shape_cast %256 : vector<16xf32> to vector<16x1xf32>
    %cst_106 = arith.constant 3.200000e+01 : f32
    %258 = vector.broadcast %cst_106 : f32 to vector<16x1xf32>
    %259 = arith.divf %257, %258 : vector<16x1xf32>
    %cst_107 = arith.constant 9.99999974E-6 : f32
    %260 = vector.broadcast %cst_107 : f32 to vector<16x1xf32>
    %261 = arith.addf %259, %260 : vector<16x1xf32>
    %262 = math.rsqrt %261 : vector<16x1xf32>
    %263 = vector.broadcast %262 : vector<16x1xf32> to vector<16x32xf32>
    %264 = arith.mulf %254, %263 : vector<16x32xf32>
    %265 = vector.broadcast %172 : vector<1x32xf32> to vector<16x32xf32>
    %266 = arith.mulf %264, %265 : vector<16x32xf32>
    %267 = vector.broadcast %173 : vector<1x32xf32> to vector<16x32xf32>
    %268 = arith.addf %266, %267 : vector<16x32xf32>
    %269 = arith.truncf %268 : vector<16x32xf32> to vector<16x32xbf16>
    %cst_108 = arith.constant dense<0.000000e+00> : vector<16x32xf32>
    %270 = tpu.matmul %269, %158, %cst_108 {dimension_numbers = #tpu.dot_dimension_numbers<[1], [0], [0], [1], [0, 0, 1, 1], [], []>} : vector<16x32xbf16>, vector<32x32xbf16>, vector<16x32xf32> -> vector<16x32xf32>
    %271 = vector.broadcast %169 : vector<1x32xf32> to vector<16x32xf32>
    %272 = arith.addf %270, %271 : vector<16x32xf32>
    %273 = arith.truncf %151 : vector<16x32xf32> to vector<16x32xbf16>
    %cst_109 = arith.constant dense<0.000000e+00> : vector<16x64xf32>
    %274 = tpu.matmul %273, %160, %cst_109 {dimension_numbers = #tpu.dot_dimension_numbers<[1], [0], [0], [1], [0, 0, 1, 1], [], []>} : vector<16x32xbf16>, vector<32x64xbf16>, vector<16x64xf32> -> vector<16x64xf32>
    %275 = vector.broadcast %170 : vector<1x64xf32> to vector<16x64xf32>
    %276 = arith.addf %274, %275 : vector<16x64xf32>
    %277 = vector.extract_strided_slice %276 {offsets = [0, 0], sizes = [16, 32], strides = [1, 1]} : vector<16x64xf32> to vector<16x32xf32>
    %278 = vector.extract_strided_slice %276 {offsets = [0, 32], sizes = [16, 32], strides = [1, 1]} : vector<16x64xf32> to vector<16x32xf32>
    %279 = vector.extract_strided_slice %272 {offsets = [0, 0], sizes = [16, 16], strides = [1, 1]} : vector<16x32xf32> to vector<16x16xf32>
    %280 = vector.shape_cast %279 : vector<16x16xf32> to vector<2x8x16xf32>
    %281 = arith.truncf %280 : vector<2x8x16xf32> to vector<2x8x16xbf16>
    %282 = vector.extract_strided_slice %277 {offsets = [0, 0], sizes = [16, 16], strides = [1, 1]} : vector<16x32xf32> to vector<16x16xf32>
    %283 = vector.shape_cast %282 : vector<16x16xf32> to vector<2x8x16xf32>
    %284 = arith.truncf %283 : vector<2x8x16xf32> to vector<2x8x16xbf16>
    %285 = vector.extract_strided_slice %278 {offsets = [0, 0], sizes = [16, 16], strides = [1, 1]} : vector<16x32xf32> to vector<16x16xf32>
    %286 = vector.shape_cast %285 : vector<16x16xf32> to vector<2x8x16xf32>
    %287 = arith.truncf %286 : vector<2x8x16xf32> to vector<2x8x16xbf16>
    "tpu.trace_start"() <{level = 10 : i32, message = "bqd,bkd->bqk"}> : () -> ()
    %cst_110 = arith.constant dense<0.000000e+00> : vector<2x8x8xf32>
    %288 = tpu.matmul %281, %284, %cst_110 {dimension_numbers = #tpu.dot_dimension_numbers<[2], [2], [1], [1], [0, 0, 0, 1, 1, 1], [0], [0]>} : vector<2x8x16xbf16>, vector<2x8x16xbf16>, vector<2x8x8xf32> -> vector<2x8x8xf32>
    "tpu.trace_stop"() : () -> ()
    %cst_111 = arith.constant 2.500000e-01 : f32
    %289 = vector.broadcast %cst_111 : f32 to vector<2x8x8xf32>
    %290 = arith.mulf %288, %289 : vector<2x8x8xf32>
    %cst_112 = arith.constant dense<0xFF800000> : vector<2x8xf32>
    %291 = vector.multi_reduction <maximumf>, %290, %cst_112 [2] : vector<2x8x8xf32> to vector<2x8xf32>
    %292 = vector.shape_cast %291 : vector<2x8xf32> to vector<2x8x1xf32>
    %293 = vector.broadcast %292 : vector<2x8x1xf32> to vector<2x8x8xf32>
    %294 = arith.subf %290, %293 : vector<2x8x8xf32>
    %295 = math.exp %294 : vector<2x8x8xf32>
    %cst_113 = arith.constant dense<0.000000e+00> : vector<2x8xf32>
    %296 = vector.multi_reduction <add>, %295, %cst_113 [2] : vector<2x8x8xf32> to vector<2x8xf32>
    %297 = vector.shape_cast %296 : vector<2x8xf32> to vector<2x8x1xf32>
    %298 = tpu.reciprocal %297 {approx = true} : vector<2x8x1xf32> -> vector<2x8x1xf32>
    %299 = vector.broadcast %298 : vector<2x8x1xf32> to vector<2x8x8xf32>
    %300 = arith.mulf %295, %299 : vector<2x8x8xf32>
    %301 = arith.truncf %300 : vector<2x8x8xf32> to vector<2x8x8xbf16>
    "tpu.trace_start"() <{level = 10 : i32, message = "bqk,bkd->bqd"}> : () -> ()
    %cst_114 = arith.constant dense<0.000000e+00> : vector<2x8x16xf32>
    %302 = tpu.matmul %301, %287, %cst_114 {dimension_numbers = #tpu.dot_dimension_numbers<[2], [1], [1], [2], [0, 0, 0, 1, 1, 2], [0], [0]>} : vector<2x8x8xbf16>, vector<2x8x16xbf16>, vector<2x8x16xf32> -> vector<2x8x16xf32>
    "tpu.trace_stop"() : () -> ()
    %303 = vector.shape_cast %302 : vector<2x8x16xf32> to vector<16x16xf32>
    %304 = vector.extract_strided_slice %272 {offsets = [0, 16], sizes = [16, 16], strides = [1, 1]} : vector<16x32xf32> to vector<16x16xf32>
    %305 = vector.shape_cast %304 : vector<16x16xf32> to vector<2x8x16xf32>
    %306 = arith.truncf %305 : vector<2x8x16xf32> to vector<2x8x16xbf16>
    %307 = vector.extract_strided_slice %277 {offsets = [0, 16], sizes = [16, 16], strides = [1, 1]} : vector<16x32xf32> to vector<16x16xf32>
    %308 = vector.shape_cast %307 : vector<16x16xf32> to vector<2x8x16xf32>
    %309 = arith.truncf %308 : vector<2x8x16xf32> to vector<2x8x16xbf16>
    %310 = vector.extract_strided_slice %278 {offsets = [0, 16], sizes = [16, 16], strides = [1, 1]} : vector<16x32xf32> to vector<16x16xf32>
    %311 = vector.shape_cast %310 : vector<16x16xf32> to vector<2x8x16xf32>
    %312 = arith.truncf %311 : vector<2x8x16xf32> to vector<2x8x16xbf16>
    "tpu.trace_start"() <{level = 10 : i32, message = "bqd,bkd->bqk"}> : () -> ()
    %cst_115 = arith.constant dense<0.000000e+00> : vector<2x8x8xf32>
    %313 = tpu.matmul %306, %309, %cst_115 {dimension_numbers = #tpu.dot_dimension_numbers<[2], [2], [1], [1], [0, 0, 0, 1, 1, 1], [0], [0]>} : vector<2x8x16xbf16>, vector<2x8x16xbf16>, vector<2x8x8xf32> -> vector<2x8x8xf32>
    "tpu.trace_stop"() : () -> ()
    %cst_116 = arith.constant 2.500000e-01 : f32
    %314 = vector.broadcast %cst_116 : f32 to vector<2x8x8xf32>
    %315 = arith.mulf %313, %314 : vector<2x8x8xf32>
    %cst_117 = arith.constant dense<0xFF800000> : vector<2x8xf32>
    %316 = vector.multi_reduction <maximumf>, %315, %cst_117 [2] : vector<2x8x8xf32> to vector<2x8xf32>
    %317 = vector.shape_cast %316 : vector<2x8xf32> to vector<2x8x1xf32>
    %318 = vector.broadcast %317 : vector<2x8x1xf32> to vector<2x8x8xf32>
    %319 = arith.subf %315, %318 : vector<2x8x8xf32>
    %320 = math.exp %319 : vector<2x8x8xf32>
    %cst_118 = arith.constant dense<0.000000e+00> : vector<2x8xf32>
    %321 = vector.multi_reduction <add>, %320, %cst_118 [2] : vector<2x8x8xf32> to vector<2x8xf32>
    %322 = vector.shape_cast %321 : vector<2x8xf32> to vector<2x8x1xf32>
    %323 = tpu.reciprocal %322 {approx = true} : vector<2x8x1xf32> -> vector<2x8x1xf32>
    %324 = vector.broadcast %323 : vector<2x8x1xf32> to vector<2x8x8xf32>
    %325 = arith.mulf %320, %324 : vector<2x8x8xf32>
    %326 = arith.truncf %325 : vector<2x8x8xf32> to vector<2x8x8xbf16>
    "tpu.trace_start"() <{level = 10 : i32, message = "bqk,bkd->bqd"}> : () -> ()
    %cst_119 = arith.constant dense<0.000000e+00> : vector<2x8x16xf32>
    %327 = tpu.matmul %326, %312, %cst_119 {dimension_numbers = #tpu.dot_dimension_numbers<[2], [1], [1], [2], [0, 0, 0, 1, 1, 2], [0], [0]>} : vector<2x8x8xbf16>, vector<2x8x16xbf16>, vector<2x8x16xf32> -> vector<2x8x16xf32>
    "tpu.trace_stop"() : () -> ()
    %328 = vector.shape_cast %327 : vector<2x8x16xf32> to vector<16x16xf32>
    %329 = tpu.concatenate %303, %328 in 1 : vector<16x16xf32>, vector<16x16xf32> -> vector<16x32xf32>
    %330 = arith.truncf %329 : vector<16x32xf32> to vector<16x32xbf16>
    %cst_120 = arith.constant dense<0.000000e+00> : vector<16x32xf32>
    %331 = tpu.matmul %330, %162, %cst_120 {dimension_numbers = #tpu.dot_dimension_numbers<[1], [0], [0], [1], [0, 0, 1, 1], [], []>} : vector<16x32xbf16>, vector<32x32xbf16>, vector<16x32xf32> -> vector<16x32xf32>
    %332 = vector.broadcast %171 : vector<1x32xf32> to vector<16x32xf32>
    %333 = arith.addf %331, %332 : vector<16x32xf32>
    %334 = arith.addf %268, %333 : vector<16x32xf32>
    %cst_121 = arith.constant dense<0.000000e+00> : vector<16xf32>
    %335 = vector.multi_reduction <add>, %334, %cst_121 [1] : vector<16x32xf32> to vector<16xf32>
    %336 = vector.shape_cast %335 : vector<16xf32> to vector<16x1xf32>
    %cst_122 = arith.constant 3.200000e+01 : f32
    %337 = vector.broadcast %cst_122 : f32 to vector<16x1xf32>
    %338 = arith.divf %336, %337 : vector<16x1xf32>
    %339 = vector.broadcast %338 : vector<16x1xf32> to vector<16x32xf32>
    %340 = arith.subf %334, %339 : vector<16x32xf32>
    %341 = arith.mulf %340, %340 : vector<16x32xf32>
    %cst_123 = arith.constant dense<0.000000e+00> : vector<16xf32>
    %342 = vector.multi_reduction <add>, %341, %cst_123 [1] : vector<16x32xf32> to vector<16xf32>
    %343 = vector.shape_cast %342 : vector<16xf32> to vector<16x1xf32>
    %cst_124 = arith.constant 3.200000e+01 : f32
    %344 = vector.broadcast %cst_124 : f32 to vector<16x1xf32>
    %345 = arith.divf %343, %344 : vector<16x1xf32>
    %cst_125 = arith.constant 9.99999974E-6 : f32
    %346 = vector.broadcast %cst_125 : f32 to vector<16x1xf32>
    %347 = arith.addf %345, %346 : vector<16x1xf32>
    %348 = math.rsqrt %347 : vector<16x1xf32>
    %349 = vector.broadcast %348 : vector<16x1xf32> to vector<16x32xf32>
    %350 = arith.mulf %340, %349 : vector<16x32xf32>
    %351 = vector.broadcast %174 : vector<1x32xf32> to vector<16x32xf32>
    %352 = arith.mulf %350, %351 : vector<16x32xf32>
    %353 = vector.broadcast %175 : vector<1x32xf32> to vector<16x32xf32>
    %354 = arith.addf %352, %353 : vector<16x32xf32>
    %355 = arith.truncf %354 : vector<16x32xf32> to vector<16x32xbf16>
    %cst_126 = arith.constant dense<0.000000e+00> : vector<16x64xf32>
    %356 = tpu.matmul %355, %164, %cst_126 {dimension_numbers = #tpu.dot_dimension_numbers<[1], [0], [0], [1], [0, 0, 1, 1], [], []>} : vector<16x32xbf16>, vector<32x64xbf16>, vector<16x64xf32> -> vector<16x64xf32>
    %357 = vector.broadcast %178 : vector<1x64xf32> to vector<16x64xf32>
    %358 = arith.addf %356, %357 : vector<16x64xf32>
    %cst_127 = arith.constant 0.000000e+00 : f32
    %359 = vector.broadcast %cst_127 : f32 to vector<16x64xf32>
    %360 = arith.maximumf %358, %359 : vector<16x64xf32>
    %361 = arith.truncf %360 : vector<16x64xf32> to vector<16x64xbf16>
    %cst_128 = arith.constant dense<0.000000e+00> : vector<16x32xf32>
    %362 = tpu.matmul %361, %166, %cst_128 {dimension_numbers = #tpu.dot_dimension_numbers<[1], [0], [0], [1], [0, 0, 1, 1], [], []>} : vector<16x64xbf16>, vector<64x32xbf16>, vector<16x32xf32> -> vector<16x32xf32>
    %363 = vector.broadcast %179 : vector<1x32xf32> to vector<16x32xf32>
    %364 = arith.addf %362, %363 : vector<16x32xf32>
    %365 = arith.addf %354, %364 : vector<16x32xf32>
    %cst_129 = arith.constant dense<0.000000e+00> : vector<16xf32>
    %366 = vector.multi_reduction <add>, %365, %cst_129 [1] : vector<16x32xf32> to vector<16xf32>
    %367 = vector.shape_cast %366 : vector<16xf32> to vector<16x1xf32>
    %cst_130 = arith.constant 3.200000e+01 : f32
    %368 = vector.broadcast %cst_130 : f32 to vector<16x1xf32>
    %369 = arith.divf %367, %368 : vector<16x1xf32>
    %370 = vector.broadcast %369 : vector<16x1xf32> to vector<16x32xf32>
    %371 = arith.subf %365, %370 : vector<16x32xf32>
    %372 = arith.mulf %371, %371 : vector<16x32xf32>
    %cst_131 = arith.constant dense<0.000000e+00> : vector<16xf32>
    %373 = vector.multi_reduction <add>, %372, %cst_131 [1] : vector<16x32xf32> to vector<16xf32>
    %374 = vector.shape_cast %373 : vector<16xf32> to vector<16x1xf32>
    %cst_132 = arith.constant 3.200000e+01 : f32
    %375 = vector.broadcast %cst_132 : f32 to vector<16x1xf32>
    %376 = arith.divf %374, %375 : vector<16x1xf32>
    %cst_133 = arith.constant 9.99999974E-6 : f32
    %377 = vector.broadcast %cst_133 : f32 to vector<16x1xf32>
    %378 = arith.addf %376, %377 : vector<16x1xf32>
    %379 = math.rsqrt %378 : vector<16x1xf32>
    %380 = vector.broadcast %379 : vector<16x1xf32> to vector<16x32xf32>
    %381 = arith.mulf %371, %380 : vector<16x32xf32>
    %382 = vector.broadcast %176 : vector<1x32xf32> to vector<16x32xf32>
    %383 = arith.mulf %381, %382 : vector<16x32xf32>
    %384 = vector.broadcast %177 : vector<1x32xf32> to vector<16x32xf32>
    %385 = arith.addf %383, %384 : vector<16x32xf32>
    %c12_134 = arith.constant 12 : index
    %c0_135 = arith.constant 0 : index
    %c0_136 = arith.constant 0 : index
    %386 = vector.load %arg4[%c12_134, %c0_135, %c0_136] : memref<13x64x128xbf16, #tpu.memory_space<vmem>>, vector<1x32x128xbf16>
    %387 = vector.shape_cast %386 : vector<1x32x128xbf16> to vector<32x128xbf16>
    %c22 = arith.constant 22 : index
    %c0_137 = arith.constant 0 : index
    %388 = vector.load %arg3[%c22, %c0_137] : memref<23x128xf32, #tpu.memory_space<vmem>>, vector<1x128xf32>
    %389 = arith.truncf %385 : vector<16x32xf32> to vector<16x32xbf16>
    %cst_138 = arith.constant dense<0.000000e+00> : vector<16x128xf32>
    %390 = tpu.matmul %389, %387, %cst_138 {dimension_numbers = #tpu.dot_dimension_numbers<[1], [0], [0], [1], [0, 0, 1, 1], [], []>} : vector<16x32xbf16>, vector<32x128xbf16>, vector<16x128xf32> -> vector<16x128xf32>
    %391 = vector.broadcast %388 : vector<1x128xf32> to vector<16x128xf32>
    %392 = arith.addf %390, %391 : vector<16x128xf32>
    %c0_139 = arith.constant 0 : index
    %c0_140 = arith.constant 0 : index
    %393 = vector.load %arg5[%c0_139, %c0_140] : memref<16x128xf32, #tpu.memory_space<vmem>>, vector<16x128xf32>
    tpu.vector_store %arg5[%c0_139, %c0_140], %392 {strides = array<i32>} : memref<16x128xf32, #tpu.memory_space<vmem>>, vector<16x128xf32>,
    return
  }
}

</mosaic_0001>

<bundles_post_ra>
// kernel: transformer1d_forward.1
= control target key start
LH: loop header
LB: loop body
LE: loop exit
PB: predicated region body
PF: predicated region fallthrough
CT: control target
= control target key end

     0   :  { %vm41_vm0 = vcmask 1042432   ;;  %v3130_v0 = vmov 0.0   ;;  %vm3131_vm1 = vmmov 0   ;;  %vm37_vm2 = vcmask 48128   ;;  %s3133_s11 = smov 64   ;;  %s3134_s12 = smov 80   ;;  %s3723_s4 = inlined_call_operand.vmem [shape: bf16[13,64,128], index: 4, kind: input, shape index: {}]   ;;  %s3724_s0 = inlined_call_operand.vmem [shape: f32[16,6], index: 0, kind: input, shape index: {}]   ;;  %s3725_s3 = inlined_call_operand.vmem [shape: f32[23,128], index: 3, kind: input, shape index: {}]   ;;  %s3726_s1 = inlined_call_operand.vmem [shape: f32[16,32], index: 1, kind: input, shape index: {}]   ;;  %s3727_s2 = inlined_call_operand.vmem [shape: f32[8,32], index: 2, kind: input, shape index: {}]   ;;  %s3728_s5 = inlined_call_operand.vmem [shape: f32[16,128], index: 5, kind: output, shape index: {}]  }
   0x1   :  { %2756 = vmatprep.subr.bf16.mxu0 %v3130_v0  ;;  %v28_v1 = vld [vmem:[%s3723_s4] sm:$0x7]  ;;  %2758 = vmatprep.mubr.msk.bf16.mxu0 %vm3131_vm1, %v3130_v0  ;;  %v31_v3 = vld [vmem:[%s3724_s0 + $0x8] sm:$0xff]  ;;  %vm141_vm3 = vcmask 261120   ;;  %vm191_vm4 = vcmask 130048   ;;  %vm289_vm5 = vcmask 64512  }
   0x2   :  { %v30_v2 = vld [vmem:[%s3724_s0] sm:$0xff]  ;;  %v43_v4 = vsel %vm41_vm0, %v28_v1, 0  ;;  %2762 = vmatprep.subr.bf16.mxu1 %v3130_v0  ;;  %2766 = vmatprep.mubr.msk.bf16.mxu1 %vm3131_vm1, %v3130_v0  ;;  %v3035_v7 = vld [vmem:[%s3723_s4 + $0x28] sm:$0xff]   ;;  %vm319_vm6 = vcmask 1043456   ;;  %s3135_s13 = smov 112   ;;  %s3136_s14 = smov 48  }
   0x3   :  { %v32_v5 = vpack.c.bf16 %v31_v3, %v30_v2  ;;  %2757 = vmatpush3.bf16.msra.mxu0 %v43_v4  ;;  %v3034_v6 = vld [vmem:[%s3723_s4 + $0x20] sm:$0xff]   ;;  %v87_v14 = vld [vmem:[%s3726_s1 + $0x8] sm:$0xff]  ;;  %s3137_s19 = smov 16   ;;  %vm837_vm7 = vcmask 523264  }
   0x4   :  { %2770 = vmatprep.subr.bf16.mxu0 %v3130_v0  ;;  %2763 = vmatpush3.bf16.msra.mxu1 %v3034_v6  ;;  %v2522_v8 = vld [vmem:[%s3725_s3] ss:$0 sm:$0xff]  ;;  %v2544_v23 = vld [vmem:[%s3725_s3 + $0x1] ss:$0 sm:$0xff] }
   0x5   :  { %2764 = vmatprep.subr.bf16.mxu1 %v3130_v0  ;;  %v86_v10 = vld [vmem:[%s3726_s1] sm:$0xff] }
   0x6   :  { %2759 = vmatmul.mubr.msk.bf16.vlgmr.msra.gmra.mrb[0].mxu0 %vm37_vm2, %v32_v5  ;;  %v3207_v18 = vld [vmem:[%s3727_s2] sm:$0xff]  ;;  %s3132_s2 = smov 96  }
   0x7   :  { %2772 = vmatprep.mubr.msk.bf16.mxu0 %vm3131_vm1, %v3130_v0 }
   0x8   :  { %2765 = vmatpush3.bf16.msra.mxu1 %v3035_v7 }
   0x9   :  { %2776 = vmatprep.subr.bf16.mxu1 %v3130_v0 }
  0xd9   :  { %v79_v9 = vpop.f32.mrb[0].mxu0 }
  0xda   :  { %v80_v11 = vadd.f32 %v2522_v8, %v79_v9  ;;  %v2760_v12 = vpop.f32.mrb[1].mxu0 }
  0xdb   :  { %v82_v13 = vpop.f32.mrb[2].mxu0 }
  0xdc   :  { %v88_v15 = vadd.f32 %v86_v10, %v80_v11  ;;  %v83_v16 = vadd.f32 %v2522_v8, %v82_v13  ;;  %v2761_v17 = vpop.f32.mrb[3].mxu0 }
  0xde   :  { %v89_v19 = vadd.f32 %v87_v14, %v83_v16  ;;  %v3210_v20 = vadd.f32 %v88_v15, %v3207_v18 }
  0xe0   :  { %v3213_v21 = vadd.f32 %v89_v19, %v3207_v18 }
  0xe2   :  { %v124_v22 = vpack.c.bf16 %v3213_v21, %v3210_v20 }
  0xe4   :  { %2767 = vmatmul.mubr.msk.bf16.vlgmr.msra.gmra.mrb[0].mxu1 %vm141_vm3, %v124_v22 }
  0xe5   :  { %2778 = vmatprep.mubr.msk.bf16.mxu1 %vm3131_vm1, %v3130_v0 }
 0x1b7   :  { %v179_v24 = vpop.f32.mrb[0].mxu1 }
 0x1b8   :  { %v180_v25 = vadd.f32 %v2544_v23, %v179_v24  ;;  %v2768_v26 = vpop.f32.mrb[1].mxu1 }
 0x1b9   :  { %v182_v27 = vpop.f32.mrb[2].mxu1 }
 0x1ba   :  { %v3223_v28 = vpack.c.bf16 %v180_v25, %v180_v25  ;;  %v183_v29 = vadd.f32 %v2544_v23, %v182_v27  ;;  %v2769_v30 = vpop.f32.mrb[3].mxu1 }
 0x1bc   :  { %189 = vrot.lane.b32.xlu0 %v3223_v28, %s3132_s2  ;;  %v3227_v31 = vpack.c.bf16 %v183_v29, %v183_v29 }
 0x1c0   :  { %239 = vrot.lane.b32.xlu0 %v3227_v31, %s3132_s2 }
 0x22e   :  { %v190_v32 = vpop.permute.xlu0 %189 }
 0x22f   :  { %v196_v33 = vsel %vm191_vm4, %v190_v32, 0 }
 0x230   :  { %2771 = vmatpush3.bf16.xpose.msra.mxu0 %v196_v33 }
 0x231   :  { %2782 = vmatprep.subr.bf16.mxu0 %v3130_v0 }
 0x232   :  { %v240_v34 = vpop.permute.xlu0 %239 }
 0x233   :  { %v245_v35 = vsel %vm191_vm4, %v240_v34, 0 }
 0x234   :  { %2777 = vmatpush3.bf16.xpose.msra.mxu1 %v245_v35 }
 0x235   :  { %2788 = vmatprep.subr.bf16.mxu1 %v3130_v0 }
 0x237   :  { %2773 = vmatmul.mubr.msk.bf16.vlgmr.msra.gmra.mrb[4].mxu0 %vm191_vm4, %v3223_v28 }
 0x238   :  { %2784 = vmatprep.mubr.msk.bf16.mxu0 %vm3131_vm1, %v3130_v0 }
 0x23b   :  { %2779 = vmatmul.mubr.msk.bf16.vlgmr.msra.gmra.mrb[4].mxu1 %vm191_vm4, %v3227_v31 }
 0x23c   :  { %2790 = vmatprep.mubr.msk.bf16.mxu1 %vm3131_vm1, %v3130_v0 }
 0x30a   :  { %v232_v36 = vpop.f32.mrb[4].mxu0 }
 0x30b   :  { %v287_v37 = vmul.f32 0.25, %v232_v36  ;;  %v2774_v38 = vpop.f32.mrb[5].mxu0 }
 0x30c   :  { %v235_v39 = vpop.f32.mrb[6].mxu0 }
 0x30d   :  { %v2775_v40 = vpop.f32.mrb[7].mxu0  ;;  %v290_v41 = vsel %vm289_vm5, %v287_v37, -inf }
 0x30e   :  { %v281_v42 = vpop.f32.mrb[4].mxu1  ;;  %291 = vmax.xlane.f32.xlu1 %v290_v41 }
 0x30f   :  { %v288_v43 = vmul.f32 0.25, %v281_v42  ;;  %v2780_v44 = vpop.f32.mrb[5].mxu1 }
 0x310   :  { %v284_v45 = vpop.f32.mrb[6].mxu1 }
 0x311   :  { %v2781_v46 = vpop.f32.mrb[7].mxu1  ;;  %v293_v47 = vsel %vm289_vm5, %v288_v43, -inf }
 0x312   :  { %294 = vmax.xlane.f32.xlu1 %v293_v47 }
 0x323   :  { %314 = vrot.lane.b32.xlu1 %v3223_v28, %s3133_s11 }
 0x327   :  { %363 = vrot.lane.b32.xlu1 %v3227_v31, %s3133_s11 }
 0x32b   :  { %413 = vrot.lane.b32.xlu1 %v3223_v28, %s3134_s12 }
 0x39b   :  { %v292_v48 = vpop.xlane.xlu1 %291 }
 0x39c   :  { %v296_v49 = vsub.f32 %v287_v37, %v292_v48 }
 0x39e   :  { %v298_v50 = vmul.f32 1.442695, %v296_v49 }
 0x39f   :  { %v295_v51 = vpop.xlane.xlu1 %294 }
 0x3a0   :  { %3062 = vpow2.f32 %v298_v50  ;;  %v297_v52 = vsub.f32 %v288_v43, %v295_v51 }
 0x3a2   :  { %v300_v53 = vmul.f32 1.442695, %v297_v52 }
 0x3a3   :  { %v315_v54 = vpop.permute.xlu1 %314 }
 0x3a4   :  { %3064 = vpow2.f32 %v300_v53  ;;  %v321_v55 = vsel %vm319_vm6, %v315_v54, 0 }
 0x3a5   :  { %2783 = vmatpush3.bf16.msra.mxu0 %v321_v55 }
 0x3a6   :  { %2794 = vmatprep.subr.bf16.mxu0 %v3130_v0 }
 0x3a7   :  { %v364_v56 = vpop.permute.xlu1 %363 }
 0x3a8   :  { %v369_v57 = vsel %vm319_vm6, %v364_v56, 0 }
 0x3a9   :  { %2789 = vmatpush3.bf16.msra.mxu1 %v369_v57 }
 0x3aa   :  { %v3063_v58 = vpop.eup %3062  ;;  %2800 = vmatprep.subr.bf16.mxu1 %v3130_v0 }
 0x3ab   :  { %v302_v59 = vsel %vm289_vm5, %v3063_v58, 0.0  ;;  %v414_v62 = vpop.permute.xlu1 %413 }
 0x3ac   :  { %303 = vadd.xlane.f32.xlu0 %v302_v59  ;;  %v419_v6 = vsel %vm191_vm4, %v414_v62, 0  ;;  %v3037_v59 = vld [vmem:[%s3723_s4 + $0x48] sm:$0xff]  }
 0x3ae   :  { %v3065_v60 = vpop.eup %3064 }
 0x3af   :  { %v305_v61 = vsel %vm289_vm5, %v3065_v60, 0.0 }
 0x3b0   :  { %306 = vadd.xlane.f32.xlu1 %v305_v61 }
 0x3c1   :  { %463 = vrot.lane.b32.xlu1 %v3227_v31, %s3134_s12 }
 0x3c2   :  { %411 = vrot.lane.b32.xlu0 %v3223_v28, %s3135_s13 }
 0x3c5   :  { %461 = vrot.lane.b32.xlu1 %v3227_v31, %s3135_s13 }
 0x439   :  { %v304_v63 = vpop.xlane.xlu0 %303 }
 0x43a   :  { %3066 = vrcp.f32 %v304_v63 }
 0x43d   :  { %v307_v1 = vpop.xlane.xlu1 %306  ;;  %v412_v11 = vpop.permute.xlu0 %411 }
 0x43e   :  { %3068 = vrcp.f32 %v307_v1 }
 0x441   :  { %v464_v8 = vpop.permute.xlu1 %463 }
 0x442   :  { %v469_v10 = vsel %vm191_vm4, %v464_v8, 0 }
 0x444   :  { %v3067_v2 = vpop.eup %3066 }
 0x445   :  { %v310_v3 = vmul.f32 %v3067_v2, %v3063_v58  ;;  %v462_v12 = vpop.permute.xlu1 %461  ;;  %v3036_v58 = vld [vmem:[%s3723_s4 + $0x40] sm:$0xff]  }
 0x447   :  { %v312_v4 = vpack.c.bf16 %v310_v3, %v310_v3 }
 0x448   :  { %v3069_v5 = vpop.eup %3068 }
 0x449   :  { %v311_v7 = vmul.f32 %v3069_v5, %v3065_v60  ;;  %2785 = vmatmul.mubr.msk.bf16.vlgmr.msra.gmra.mrb[8].mxu0 %vm289_vm5, %v312_v4 }
 0x44a   :  { %2795 = vmatpush3.bf16.xpose.msra.mxu0 %v419_v6  ;;  %2796 = vmatprep.mubr.msk.bf16.mxu0 %vm3131_vm1, %v3130_v0 }
 0x44b   :  { %v313_v9 = vpack.c.bf16 %v311_v7, %v311_v7  ;;  %2806 = vmatprep.subr.bf16.mxu0 %v3130_v0 }
 0x44d   :  { %2791 = vmatmul.mubr.msk.bf16.vlgmr.msra.gmra.mrb[8].mxu1 %vm289_vm5, %v313_v9 }
 0x44e   :  { %2801 = vmatpush3.bf16.xpose.msra.mxu1 %v469_v10  ;;  %2802 = vmatprep.mubr.msk.bf16.mxu1 %vm3131_vm1, %v3130_v0 }
 0x44f   :  { %2812 = vmatprep.subr.bf16.mxu1 %v3130_v0 }
 0x451   :  { %2797 = vmatmul.mubr.msk.bf16.vlgmr.msra.gmra.mrb[12].mxu0 %vm191_vm4, %v412_v11 }
 0x452   :  { %2808 = vmatprep.mubr.msk.bf16.mxu0 %vm3131_vm1, %v3130_v0 }
 0x455   :  { %2803 = vmatmul.mubr.msk.bf16.vlgmr.msra.gmra.mrb[12].mxu1 %vm191_vm4, %v462_v12  ;;  %v2556_v12 = vld [vmem:[%s3725_s3 + $0x2] ss:$0 sm:$0xff] }
 0x456   :  { %2814 = vmatprep.mubr.msk.bf16.mxu1 %vm3131_vm1, %v3130_v0 }
 0x51c   :  { %v3279_v13 = vpop.f32.mrb[8].mxu0 }
 0x51d   :  { %v2786_v14 = vpop.f32.mrb[9].mxu0 }
 0x51e   :  { %v360_v15 = vpop.f32.mrb[10].mxu0 }
 0x51f   :  { %v2787_v16 = vpop.f32.mrb[11].mxu0 }
 0x520   :  { %v3281_v17 = vpop.f32.mrb[8].mxu1 }
 0x521   :  { %v2792_v19 = vpop.f32.mrb[9].mxu1 }
 0x522   :  { %v408_v22 = vpop.f32.mrb[10].mxu1 }
 0x523   :  { %v2793_v23 = vpop.f32.mrb[11].mxu1 }
 0x524   :  { %v455_v24 = vpop.f32.mrb[12].mxu0 }
 0x525   :  { %v511_v25 = vmul.f32 0.25, %v455_v24  ;;  %v2798_v26 = vpop.f32.mrb[13].mxu0 }
 0x526   :  { %v458_v27 = vpop.f32.mrb[14].mxu0 }
 0x527   :  { %v2799_v29 = vpop.f32.mrb[15].mxu0  ;;  %v513_v30 = vsel %vm289_vm5, %v511_v25, -inf }
 0x528   :  { %v505_v32 = vpop.f32.mrb[12].mxu1  ;;  %514 = vmax.xlane.f32.xlu1 %v513_v30 }
 0x529   :  { %v512_v33 = vmul.f32 0.25, %v505_v32  ;;  %v2804_v34 = vpop.f32.mrb[13].mxu1 }
 0x52a   :  { %v508_v35 = vpop.f32.mrb[14].mxu1 }
 0x52b   :  { %v2805_v36 = vpop.f32.mrb[15].mxu1  ;;  %v516_v37 = vsel %vm289_vm5, %v512_v33, -inf }
 0x52c   :  { %517 = vmax.xlane.f32.xlu0 %v516_v37  ;;  %v3039_v37 = vld [vmem:[%s3723_s4 + $0x68] sm:$0xff]  }
 0x542   :  { %585 = vrot.lane.b32.xlu0 %v3227_v31, %s3136_s14 }
 0x5b5   :  { %v515_v38 = vpop.xlane.xlu1 %514 }
 0x5b6   :  { %v519_v39 = vsub.f32 %v511_v25, %v515_v38  ;;  %v3040_v38 = vld [vmem:[%s3723_s4 + $0x80] sm:$0xff]  }
 0x5b8   :  { %v521_v40 = vmul.f32 1.442695, %v519_v39  ;;  %v3041_v39 = vld [vmem:[%s3723_s4 + $0x88] sm:$0xff]  }
 0x5b9   :  { %v518_v41 = vpop.xlane.xlu0 %517 }
 0x5ba   :  { %3070 = vpow2.f32 %v521_v40  ;;  %v520_v42 = vsub.f32 %v512_v33, %v518_v41 }
 0x5bc   :  { %v523_v43 = vmul.f32 1.442695, %v520_v42 }
 0x5bd   :  { %v586_v44 = vpop.permute.xlu0 %585 }
 0x5be   :  { %3072 = vpow2.f32 %v523_v43  ;;  %v591_v45 = vsel %vm319_vm6, %v586_v44, 0 }
 0x5bf   :  { %2813 = vmatpush3.bf16.msra.mxu1 %v591_v45 }
 0x5c0   :  { %2826 = vmatprep.subr.bf16.mxu1 %v3130_v0 }
 0x5c4   :  { %v3071_v46 = vpop.eup %3070 }
 0x5c5   :  { %v525_v47 = vsel %vm289_vm5, %v3071_v46, 0.0 }
 0x5c6   :  { %526 = vadd.xlane.f32.xlu1 %v525_v47  ;;  %v2560_v47 = vld [vmem:[%s3725_s3 + $0x3] ss:$0 sm:$0xff] }
 0x5c8   :  { %v3073_v48 = vpop.eup %3072 }
 0x5c9   :  { %v528_v31 = vsel %vm289_vm5, %v3073_v48, 0.0 }
 0x5ca   :  { %529 = vadd.xlane.f32.xlu1 %v528_v31 }
 0x5db   :  { %537 = vrot.lane.b32.xlu1 %v3223_v28, %s3136_s14 }
 0x653   :  { %v527_v49 = vpop.xlane.xlu1 %526 }
 0x654   :  { %3074 = vrcp.f32 %v527_v49 }
 0x657   :  { %v530_v50 = vpop.xlane.xlu1 %529 }
 0x658   :  { %3076 = vrcp.f32 %v530_v50 }
 0x65b   :  { %v538_v51 = vpop.permute.xlu1 %537 }
 0x65c   :  { %v543_v52 = vsel %vm319_vm6, %v538_v51, 0  ;;  %v2561_v51 = vld [vmem:[%s3725_s3 + $0x4] ss:$0 sm:$0xff] }
 0x65d   :  { %2807 = vmatpush3.bf16.msra.mxu0 %v543_v52 }
 0x65e   :  { %v3075_v53 = vpop.eup %3074  ;;  %2818 = vmatprep.subr.bf16.mxu0 %v3130_v0 }
 0x65f   :  { %v533_v54 = vmul.f32 %v3075_v53, %v3071_v46 }
 0x661   :  { %v535_v55 = vpack.c.bf16 %v533_v54, %v533_v54 }
 0x662   :  { %v3077_v56 = vpop.eup %3076 }
 0x663   :  { %v534_v57 = vmul.f32 %v3077_v56, %v3073_v48  ;;  %2809 = vmatmul.mubr.msk.bf16.vlgmr.msra.gmra.mrb[16].mxu0 %vm289_vm5, %v535_v55  ;;  %v3042_v56 = vld [vmem:[%s3723_s4 + $0x90] sm:$0xff]  }
 0x664   :  { %2822 = vmatprep.mubr.msk.bf16.mxu0 %vm3131_vm1, %v3130_v0  ;;  %2819 = vmatpush3.bf16.msra.mxu0 %v3036_v58 }
 0x665   :  { %v536_v28 = vpack.c.bf16 %v534_v57, %v534_v57  ;;  %2820 = vmatprep.subr.bf16.mxu0 %v3130_v0  ;;  %v3043_v57 = vld [vmem:[%s3723_s4 + $0x98] sm:$0xff]  }
 0x667   :  { %2815 = vmatmul.mubr.msk.bf16.vlgmr.msra.gmra.mrb[16].mxu1 %vm289_vm5, %v536_v28  ;;  %v2562_v28 = vld [vmem:[%s3725_s3 + $0x5] ss:$0 sm:$0xff] }
 0x668   :  { %2830 = vmatprep.mubr.msk.bf16.mxu1 %vm3131_vm1, %v3130_v0  ;;  %2821 = vmatpush3.bf16.msra.mxu0 %v3037_v59 }
 0x669   :  { %2834 = vmatprep.subr.bf16.mxu0 %v3130_v0 }
 0x736   :  { %v579_v60 = vpop.f32.mrb[16].mxu0 }
 0x737   :  { %v2810_v61 = vpop.f32.mrb[17].mxu0 }
 0x738   :  { %v582_v62 = vpop.f32.mrb[18].mxu0 }
 0x739   :  { %v2811_v63 = vpop.f32.mrb[19].mxu0 }
 0x73a   :  { %v627_v1 = vpop.f32.mrb[16].mxu1 }
 0x73b   :  { %v3019_v2 = vpack.i.bf16 %v627_v1, %v579_v60  ;;  %v2816_v3 = vpop.f32.mrb[17].mxu1 }
 0x73c   :  { %v630_v4 = vpop.f32.mrb[18].mxu1 }
 0x73d   :  { %v2817_v5 = vpop.f32.mrb[19].mxu1  ;;  %3020 = vrot.lane.b32.xlu1 %v3019_v2, %s3137_s19  ;;  %v2566_v4 = vld [vmem:[%s3725_s3 + $0x6] ss:$0 sm:$0xff] }
 0x7af   :  { %v3021_v6 = vpop.permute.xlu1 %3020 }
 0x7b0   :  { %v3023_v7 = vunpack.i.h.bf16 %v3021_v6  ;;  %v3022_v8 = vunpack.i.l.bf16 %v3021_v6 }
 0x7b2   :  { %v642_v9 = vsel %vm191_vm4, %v3281_v17, %v3023_v7  ;;  %v641_v10 = vsel %vm191_vm4, %v3279_v13, %v3022_v8 }
 0x7b3   :  { %v643_v11 = vpack.c.bf16 %v642_v9, %v641_v10 }
 0x7b5   :  { %2823 = vmatmul.mubr.msk.bf16.vlgmr.msra.gmra.mrb[20].mxu0 %vm141_vm3, %v643_v11 }
 0x7b6   :  { %2842 = vmatprep.mubr.msk.bf16.mxu0 %vm3131_vm1, %v3130_v0  ;;  %2835 = vmatpush3.bf16.msra.mxu0 %v3040_v38 }
 0x7b7   :  { %2836 = vmatprep.subr.bf16.mxu0 %v3130_v0 }
 0x7ba   :  { %2837 = vmatpush3.bf16.msra.mxu0 %v3041_v39 }
 0x7bb   :  { %2838 = vmatprep.subr.bf16.mxu0 %v3130_v0 }
 0x7be   :  { %2839 = vmatpush3.bf16.msra.mxu0 %v3042_v56 }
 0x7bf   :  { %2840 = vmatprep.subr.bf16.mxu0 %v3130_v0 }
 0x7c2   :  { %2841 = vmatpush3.bf16.msra.mxu0 %v3043_v57 }
 0x7c3   :  { %2860 = vmatprep.subr.bf16.mxu0 %v3130_v0 }
 0x888   :  { %v697_v14 = vpop.f32.mrb[20].mxu0 }
 0x889   :  { %v698_v15 = vadd.f32 %v2556_v12, %v697_v14  ;;  %v2824_v16 = vpop.f32.mrb[21].mxu0 }
 0x88a   :  { %v700_v19 = vpop.f32.mrb[22].mxu0 }
 0x88b   :  { %v701_v22 = vadd.f32 %v2556_v12, %v700_v19  ;;  %v2825_v23 = vpop.f32.mrb[23].mxu0  ;;  %v704_v17 = vadd.f32 %v698_v15, %v3210_v20 }
 0x88d   :  { %v706_v13 = vsel %vm141_vm3, %v704_v17, 0.0  ;;  %v705_v24 = vadd.f32 %v701_v22, %v3213_v21  ;;  %v3038_v21 = vld [vmem:[%s3723_s4 + $0x60] sm:$0xff]  }
 0x88e   :  { %707 = vadd.xlane.f32.xlu1 %v706_v13  ;;  %2827 = vmatpush3.bf16.msra.mxu1 %v3038_v21 }
 0x88f   :  { %v709_v25 = vsel %vm141_vm3, %v705_v24, 0.0  ;;  %2828 = vmatprep.subr.bf16.mxu1 %v3130_v0 }
 0x890   :  { %710 = vadd.xlane.f32.xlu0 %v709_v25 }
 0x892   :  { %2829 = vmatpush3.bf16.msra.mxu1 %v3039_v37  ;;  %v2572_v37 = vld [vmem:[%s3725_s3 + $0x7] ss:$0 sm:$0xff] }
 0x893   :  { %2846 = vmatprep.subr.bf16.mxu1 %v3130_v0 }
 0x91b   :  { %v708_v26 = vpop.xlane.xlu1 %707 }
 0x91c   :  { %v713_v27 = vmul.f32 0.03125, %v708_v26 }
 0x91d   :  { %v711_v29 = vpop.xlane.xlu0 %710 }
 0x91e   :  { %v715_v30 = vsub.f32 %v704_v17, %v713_v27  ;;  %v714_v32 = vmul.f32 0.03125, %v711_v29  ;;  %v3044_v29 = vld [vmem:[%s3723_s4 + $0xa0] sm:$0xff]  }
 0x920   :  { %v716_v33 = vsub.f32 %v705_v24, %v714_v32  ;;  %v717_v34 = vmul.f32 %v715_v30, %v715_v30 }
 0x922   :  { %v719_v35 = vsel %vm141_vm3, %v717_v34, 0.0  ;;  %v718_v36 = vmul.f32 %v716_v33, %v716_v33 }
 0x923   :  { %720 = vadd.xlane.f32.xlu0 %v719_v35 }
 0x924   :  { %v722_v20 = vsel %vm141_vm3, %v718_v36, 0.0 }
 0x925   :  { %723 = vadd.xlane.f32.xlu1 %v722_v20 }
 0x9b0   :  { %v721_v40 = vpop.xlane.xlu0 %720 }
 0x9b1   :  { %v725_v41 = vmul.f32 0.03125, %v721_v40  ;;  %v2573_v40 = vld [vmem:[%s3725_s3 + $0x8] ss:$0 sm:$0xff] }
 0x9b2   :  { %v724_v42 = vpop.xlane.xlu1 %723 }
 0x9b3   :  { %v727_v43 = vadd.f32 1e-05, %v725_v41  ;;  %v726_v44 = vmul.f32 0.03125, %v724_v42 }
 0x9b5   :  { %3078 = vrsqrt.f32 %v727_v43  ;;  %v728_v45 = vadd.f32 1e-05, %v726_v44 }
 0x9b7   :  { %3080 = vrsqrt.f32 %v728_v45 }
 0x9bf   :  { %v3079_v46 = vpop.eup %3078 }
 0x9c0   :  { %v731_v48 = vmul.f32 %v3079_v46, %v715_v30  ;;  %v3045_v30 = vld [vmem:[%s3723_s4 + $0xa8] sm:$0xff]  }
 0x9c1   :  { %v3081_v31 = vpop.eup %3080 }
 0x9c2   :  { %v737_v49 = vmul.f32 %v2560_v47, %v731_v48  ;;  %v732_v50 = vmul.f32 %v3081_v31, %v716_v33 }
 0x9c4   :  { %v738_v52 = vmul.f32 %v2560_v47, %v732_v50  ;;  %v743_v53 = vadd.f32 %v2561_v51, %v737_v49  ;;  %v2606_v49 = vld [vmem:[%s3725_s3 + $0x9] ss:$0 sm:$0xff] }
 0x9c6   :  { %v744_v54 = vadd.f32 %v2561_v51, %v738_v52 }
 0x9c8   :  { %v745_v55 = vpack.c.bf16 %v744_v54, %v743_v53 }
 0x9ca   :  { %2831 = vmatmul.mubr.msk.bf16.vlgmr.msra.gmra.mrb[20].mxu1 %vm141_vm3, %v745_v55 }
 0x9cb   :  { %2850 = vmatprep.mubr.msk.bf16.mxu1 %vm3131_vm1, %v3130_v0  ;;  %2847 = vmatpush3.bf16.msra.mxu1 %v3044_v29 }
 0x9cc   :  { %2848 = vmatprep.subr.bf16.mxu1 %v3130_v0 }
 0x9cf   :  { %2849 = vmatpush3.bf16.msra.mxu1 %v3045_v30 }
 0x9d0   :  { %2854 = vmatprep.subr.bf16.mxu1 %v3130_v0 }
 0xa9d   :  { %v799_v58 = vpop.f32.mrb[20].mxu1 }
 0xa9e   :  { %v800_v59 = vadd.f32 %v2562_v28, %v799_v58  ;;  %v2832_v60 = vpop.f32.mrb[21].mxu1 }
 0xa9f   :  { %v802_v61 = vpop.f32.mrb[22].mxu1  ;;  %v21_v60 = vlaneseq }
 0xaa0   :  { %v803_v62 = vadd.f32 %v2562_v28, %v802_v61  ;;  %v2833_v63 = vpop.f32.mrb[23].mxu1  ;;  %v806_v1 = vmax.f32 %v800_v59, 0.0 }
 0xaa1   :  { %v22_v61 = vshrl.u32 %v21_v60, 7 }
 0xaa2   :  { %v807_v2 = vmax.f32 %v803_v62, 0.0  ;;  %v24_v62 = vand.u32 127, %v21_v60 }
 0xaa4   :  { %v808_v3 = vpack.c.bf16 %v807_v2, %v806_v1  ;;  %vm25_vm8 = vcmp.le.s32.totalorder %v24_v62, %v22_v61  ;;  %v3138_v1 = vmov -1e+30  }
 0xaa5   :  { %v3428_v2 = vsel %vm25_vm8, 0.0, %v3138_v1 }
 0xaa6   :  { %2843 = vmatmul.mubr.msk.bf16.vlgmr.msra.gmra.mrb[24].mxu0 %vm837_vm7, %v808_v3 }
 0xaa7   :  { %2862 = vmatprep.mubr.msk.bf16.mxu0 %vm3131_vm1, %v3130_v0 }
 0xb79   :  { %v875_v5 = vpop.f32.mrb[24].mxu0 }
 0xb7a   :  { %v876_v6 = vadd.f32 %v2566_v4, %v875_v5  ;;  %v2844_v7 = vpop.f32.mrb[25].mxu0 }
 0xb7b   :  { %v878_v8 = vpop.f32.mrb[26].mxu0 }
 0xb7c   :  { %v879_v9 = vadd.f32 %v2566_v4, %v878_v8  ;;  %v2845_v10 = vpop.f32.mrb[27].mxu0  ;;  %v882_v11 = vadd.f32 %v876_v6, %v743_v53 }
 0xb7e   :  { %v884_v12 = vsel %vm141_vm3, %v882_v11, 0.0  ;;  %v883_v14 = vadd.f32 %v879_v9, %v744_v54 }
 0xb7f   :  { %885 = vadd.xlane.f32.xlu0 %v884_v12 }
 0xb80   :  { %v887_v15 = vsel %vm141_vm3, %v883_v14, 0.0 }
 0xb81   :  { %888 = vadd.xlane.f32.xlu1 %v887_v15 }
 0xc0c   :  { %v886_v16 = vpop.xlane.xlu0 %885 }
 0xc0d   :  { %v890_v19 = vmul.f32 0.03125, %v886_v16 }
 0xc0e   :  { %v889_v22 = vpop.xlane.xlu1 %888 }
 0xc0f   :  { %v892_v23 = vsub.f32 %v882_v11, %v890_v19  ;;  %v891_v17 = vmul.f32 0.03125, %v889_v22 }
 0xc11   :  { %v893_v13 = vsub.f32 %v883_v14, %v891_v17  ;;  %v894_v24 = vmul.f32 %v892_v23, %v892_v23 }
 0xc13   :  { %v896_v25 = vsel %vm141_vm3, %v894_v24, 0.0  ;;  %v895_v26 = vmul.f32 %v893_v13, %v893_v13 }
 0xc14   :  { %897 = vadd.xlane.f32.xlu0 %v896_v25 }
 0xc15   :  { %v899_v27 = vsel %vm141_vm3, %v895_v26, 0.0 }
 0xc16   :  { %900 = vadd.xlane.f32.xlu1 %v899_v27 }
 0xca1   :  { %v898_v32 = vpop.xlane.xlu0 %897 }
 0xca2   :  { %v902_v33 = vmul.f32 0.03125, %v898_v32 }
 0xca3   :  { %v901_v34 = vpop.xlane.xlu1 %900 }
 0xca4   :  { %v904_v35 = vadd.f32 1e-05, %v902_v33  ;;  %v903_v36 = vmul.f32 0.03125, %v901_v34 }
 0xca6   :  { %3082 = vrsqrt.f32 %v904_v35  ;;  %v905_v20 = vadd.f32 1e-05, %v903_v36 }
 0xca8   :  { %3084 = vrsqrt.f32 %v905_v20 }
 0xcb0   :  { %v3083_v21 = vpop.eup %3082 }
 0xcb1   :  { %v908_v38 = vmul.f32 %v3083_v21, %v892_v23 }
 0xcb2   :  { %v3085_v39 = vpop.eup %3084 }
 0xcb3   :  { %v914_v41 = vmul.f32 %v2572_v37, %v908_v38  ;;  %v909_v42 = vmul.f32 %v3085_v39, %v893_v13 }
 0xcb5   :  { %v915_v43 = vmul.f32 %v2572_v37, %v909_v42  ;;  %v3386_v44 = vadd.f32 %v2573_v40, %v914_v41 }
 0xcb7   :  { %v3388_v45 = vadd.f32 %v2573_v40, %v915_v43  ;;  %v3392_v46 = vadd.f32 %v3386_v44, %v3207_v18 }
 0xcb9   :  { %v3396_v47 = vadd.f32 %v3388_v45, %v3207_v18  ;;  %v1657_v48 = vpack.c.bf16 %v3388_v45, %v3386_v44  ;;  %v2628_v45 = vld [vmem:[%s3725_s3 + $0xc] ss:$0 sm:$0xff] }
 0xcbb   :  { %v976_v31 = vpack.c.bf16 %v3396_v47, %v3392_v46 }
 0xcbd   :  { %2851 = vmatmul.mubr.msk.bf16.vlgmr.msra.gmra.mrb[24].mxu1 %vm141_vm3, %v976_v31 }
 0xcbe   :  { %2856 = vmatprep.mubr.msk.bf16.mxu1 %vm3131_vm1, %v3130_v0 }
 0xd90   :  { %v1030_v50 = vpop.f32.mrb[24].mxu1 }
 0xd91   :  { %v1031_v51 = vadd.f32 %v2606_v49, %v1030_v50  ;;  %v2852_v52 = vpop.f32.mrb[25].mxu1 }
 0xd92   :  { %v1033_v18 = vpop.f32.mrb[26].mxu1 }
 0xd93   :  { %v3408_v53 = vpack.c.bf16 %v1031_v51, %v1031_v51  ;;  %v1034_v54 = vadd.f32 %v2606_v49, %v1033_v18  ;;  %v2853_v55 = vpop.f32.mrb[27].mxu1 }
 0xd95   :  { %v3410_v56 = vpack.c.bf16 %v1034_v54, %v1034_v54  ;;  %1040 = vrot.lane.b32.xlu0 %v3408_v53, %s3132_s2 }
 0xd97   :  { %1089 = vrot.lane.b32.xlu1 %v3410_v56, %s3132_s2 }
 0xe07   :  { %v1041_v57 = vpop.permute.xlu0 %1040 }
 0xe08   :  { %v1046_v28 = vsel %vm191_vm4, %v1041_v57, 0 }
 0xe09   :  { %2855 = vmatpush3.bf16.xpose.msra.mxu1 %v1046_v28  ;;  %v1090_v58 = vpop.permute.xlu1 %1089 }
 0xe0a   :  { %v1095_v59 = vsel %vm191_vm4, %v1090_v58, 0  ;;  %2866 = vmatprep.subr.bf16.mxu1 %v3130_v0 }
 0xe0b   :  { %2861 = vmatpush3.bf16.xpose.msra.mxu0 %v1095_v59 }
 0xe0c   :  { %2872 = vmatprep.subr.bf16.mxu0 %v3130_v0 }
 0xe10   :  { %2857 = vmatmul.mubr.msk.bf16.vlgmr.msra.gmra.mrb[28].mxu1 %vm191_vm4, %v3408_v53 }
 0xe11   :  { %2868 = vmatprep.mubr.msk.bf16.mxu1 %vm3131_vm1, %v3130_v0 }
 0xe12   :  { %2863 = vmatmul.mubr.msk.bf16.vlgmr.msra.gmra.mrb[28].mxu0 %vm191_vm4, %v3410_v56 }
 0xe13   :  { %2874 = vmatprep.mubr.msk.bf16.mxu0 %vm3131_vm1, %v3130_v0 }
 0xee3   :  { %v1082_v63 = vpop.f32.mrb[28].mxu1 }
 0xee4   :  { %v1137_v3 = vmul.f32 0.25, %v1082_v63  ;;  %v2858_v4 = vpop.f32.mrb[29].mxu1 }
 0xee5   :  { %v1085_v5 = vpop.f32.mrb[30].mxu1  ;;  %v1131_v6 = vpop.f32.mrb[28].mxu0 }
 0xee6   :  { %v1138_v7 = vmul.f32 0.25, %v1131_v6  ;;  %v2859_v8 = vpop.f32.mrb[31].mxu1  ;;  %v2864_v9 = vpop.f32.mrb[29].mxu0  ;;  %v1139_v10 = vadd.f32 %v1137_v3, %v3428_v2 }
 0xee7   :  { %v1134_v11 = vpop.f32.mrb[30].mxu0 }
 0xee8   :  { %v2865_v12 = vpop.f32.mrb[31].mxu0  ;;  %v1141_v14 = vsel %vm289_vm5, %v1139_v10, -inf  ;;  %v1140_v15 = vadd.f32 %v1138_v7, %v3428_v2 }
 0xee9   :  { %1142 = vmax.xlane.f32.xlu1 %v1141_v14 }
 0xeea   :  { %v1144_v16 = vsel %vm289_vm5, %v1140_v15, -inf }
 0xeeb   :  { %1145 = vmax.xlane.f32.xlu0 %v1144_v16 }
 0xefa   :  { %1213 = vrot.lane.b32.xlu1 %v3410_v56, %s3133_s11 }
 0xf01   :  { %1165 = vrot.lane.b32.xlu0 %v3408_v53, %s3133_s11 }
 0xf76   :  { %v1143_v19 = vpop.xlane.xlu1 %1142 }
 0xf77   :  { %v1147_v22 = vsub.f32 %v1139_v10, %v1143_v19 }
 0xf78   :  { %v1146_v23 = vpop.xlane.xlu0 %1145 }
 0xf79   :  { %v1149_v17 = vmul.f32 1.442695, %v1147_v22  ;;  %v1148_v13 = vsub.f32 %v1140_v15, %v1146_v23 }
 0xf7a   :  { %v1214_v24 = vpop.permute.xlu1 %1213 }
 0xf7b   :  { %3086 = vpow2.f32 %v1149_v17  ;;  %v1151_v25 = vmul.f32 1.442695, %v1148_v13  ;;  %v1219_v26 = vsel %vm319_vm6, %v1214_v24, 0 }
 0xf7c   :  { %2873 = vmatpush3.bf16.msra.mxu0 %v1219_v26  ;;  %v1166_v27 = vpop.permute.xlu0 %1165 }
 0xf7d   :  { %3088 = vpow2.f32 %v1151_v25  ;;  %v1171_v29 = vsel %vm319_vm6, %v1166_v27, 0  ;;  %2884 = vmatprep.subr.bf16.mxu0 %v3130_v0 }
 0xf7e   :  { %2867 = vmatpush3.bf16.msra.mxu1 %v1171_v29 }
 0xf7f   :  { %2878 = vmatprep.subr.bf16.mxu1 %v3130_v0 }
 0xf85   :  { %v3087_v30 = vpop.eup %3086 }
 0xf86   :  { %v1153_v32 = vsel %vm289_vm5, %v3087_v30, 0.0 }
 0xf87   :  { %v3089_v33 = vpop.eup %3088  ;;  %1154 = vadd.xlane.f32.xlu0 %v1153_v32 }
 0xf88   :  { %v1156_v34 = vsel %vm289_vm5, %v3089_v33, 0.0 }
 0xf89   :  { %1157 = vadd.xlane.f32.xlu1 %v1156_v34 }
 0xf9a   :  { %1263 = vrot.lane.b32.xlu1 %v3408_v53, %s3134_s12 }
 0xf9d   :  { %1313 = vrot.lane.b32.xlu0 %v3410_v56, %s3134_s12 }
 0xf9e   :  { %1261 = vrot.lane.b32.xlu1 %v3408_v53, %s3135_s13 }
 0xfa1   :  { %1311 = vrot.lane.b32.xlu0 %v3410_v56, %s3135_s13 }
0x1014   :  { %v1155_v35 = vpop.xlane.xlu0 %1154 }
0x1015   :  { %3090 = vrcp.f32 %v1155_v35  ;;  %v3046_v35 = vld [vmem:[%s3723_s4 + $0xc0] sm:$0xff]  }
0x1016   :  { %v1158_v36 = vpop.xlane.xlu1 %1157 }
0x1017   :  { %3092 = vrcp.f32 %v1158_v36  ;;  %v3047_v36 = vld [vmem:[%s3723_s4 + $0xc8] sm:$0xff]  }
0x1018   :  { %v1314_v41 = vpop.permute.xlu0 %1313 }
0x1019   :  { %v1319_v31 = vsel %vm191_vm4, %v1314_v41, 0 }
0x101a   :  { %v1264_v38 = vpop.permute.xlu1 %1263 }
0x101b   :  { %v1269_v42 = vsel %vm191_vm4, %v1264_v38, 0 }
0x101c   :  { %v1312_v50 = vpop.permute.xlu0 %1311 }
0x101e   :  { %v1262_v49 = vpop.permute.xlu1 %1261 }
0x101f   :  { %v3091_v20 = vpop.eup %3090 }
0x1020   :  { %v1161_v21 = vmul.f32 %v3091_v20, %v3087_v30 }
0x1021   :  { %v3093_v37 = vpop.eup %3092 }
0x1022   :  { %v1162_v39 = vmul.f32 %v3093_v37, %v3089_v33  ;;  %v1163_v40 = vpack.c.bf16 %v1161_v21, %v1161_v21 }
0x1024   :  { %2869 = vmatmul.mubr.msk.bf16.vlgmr.msra.gmra.mrb[32].mxu1 %vm289_vm5, %v1163_v40  ;;  %v1164_v43 = vpack.c.bf16 %v1162_v39, %v1162_v39 }
0x1025   :  { %2879 = vmatpush3.bf16.xpose.msra.mxu1 %v1269_v42  ;;  %2880 = vmatprep.mubr.msk.bf16.mxu1 %vm3131_vm1, %v3130_v0 }
0x1026   :  { %2875 = vmatmul.mubr.msk.bf16.vlgmr.msra.gmra.mrb[32].mxu0 %vm289_vm5, %v1164_v43  ;;  %2890 = vmatprep.subr.bf16.mxu1 %v3130_v0 }
0x1027   :  { %2885 = vmatpush3.bf16.xpose.msra.mxu0 %v1319_v31  ;;  %2886 = vmatprep.mubr.msk.bf16.mxu0 %vm3131_vm1, %v3130_v0 }
0x1028   :  { %2896 = vmatprep.subr.bf16.mxu0 %v3130_v0 }
0x102c   :  { %2881 = vmatmul.mubr.msk.bf16.vlgmr.msra.gmra.mrb[36].mxu1 %vm191_vm4, %v1262_v49 }
0x102d   :  { %2892 = vmatprep.mubr.msk.bf16.mxu1 %vm3131_vm1, %v3130_v0 }
0x102e   :  { %2887 = vmatmul.mubr.msk.bf16.vlgmr.msra.gmra.mrb[36].mxu0 %vm191_vm4, %v1312_v50 }
0x102f   :  { %2898 = vmatprep.mubr.msk.bf16.mxu0 %vm3131_vm1, %v3130_v0 }
0x10f7   :  { %v3468_v51 = vpop.f32.mrb[32].mxu1 }
0x10f8   :  { %v2870_v52 = vpop.f32.mrb[33].mxu1 }
0x10f9   :  { %v1210_v18 = vpop.f32.mrb[34].mxu1  ;;  %v3470_v54 = vpop.f32.mrb[32].mxu0 }
0x10fa   :  { %v2871_v55 = vpop.f32.mrb[35].mxu1  ;;  %v2876_v57 = vpop.f32.mrb[33].mxu0 }
0x10fb   :  { %v1258_v28 = vpop.f32.mrb[34].mxu0  ;;  %v3048_v55 = vld [vmem:[%s3723_s4 + $0x100] sm:$0xff]  }
0x10fc   :  { %v2877_v58 = vpop.f32.mrb[35].mxu0  ;;  %v3049_v28 = vld [vmem:[%s3723_s4 + $0x108] sm:$0xff]  }
0x10ff   :  { %v1305_v59 = vpop.f32.mrb[36].mxu1 }
0x1100   :  { %v1361_v60 = vmul.f32 0.25, %v1305_v59  ;;  %v2882_v61 = vpop.f32.mrb[37].mxu1 }
0x1101   :  { %v1308_v62 = vpop.f32.mrb[38].mxu1  ;;  %v1355_v63 = vpop.f32.mrb[36].mxu0 }
0x1102   :  { %v1362_v1 = vmul.f32 0.25, %v1355_v63  ;;  %v2883_v3 = vpop.f32.mrb[39].mxu1  ;;  %v2888_v4 = vpop.f32.mrb[37].mxu0  ;;  %v1363_v5 = vadd.f32 %v1361_v60, %v3428_v2 }
0x1103   :  { %v1358_v6 = vpop.f32.mrb[38].mxu0 }
0x1104   :  { %v2889_v7 = vpop.f32.mrb[39].mxu0  ;;  %v1365_v8 = vsel %vm289_vm5, %v1363_v5, -inf  ;;  %v1364_v9 = vadd.f32 %v1362_v1, %v3428_v2 }
0x1105   :  { %1366 = vmax.xlane.f32.xlu1 %v1365_v8 }
0x1106   :  { %v1368_v10 = vsel %vm289_vm5, %v1364_v9, -inf }
0x1107   :  { %1369 = vmax.xlane.f32.xlu0 %v1368_v10 }
0x1192   :  { %v1367_v11 = vpop.xlane.xlu1 %1366 }
0x1193   :  { %v1371_v12 = vsub.f32 %v1363_v5, %v1367_v11 }
0x1194   :  { %v1370_v14 = vpop.xlane.xlu0 %1369 }
0x1195   :  { %v1373_v15 = vmul.f32 1.442695, %v1371_v12  ;;  %v1372_v16 = vsub.f32 %v1364_v9, %v1370_v14 }
0x1197   :  { %3094 = vpow2.f32 %v1373_v15  ;;  %v1375_v19 = vmul.f32 1.442695, %v1372_v16 }
0x1199   :  { %3096 = vpow2.f32 %v1375_v19 }
0x11a1   :  { %v3095_v22 = vpop.eup %3094 }
0x11a2   :  { %v1377_v23 = vsel %vm289_vm5, %v3095_v22, 0.0 }
0x11a3   :  { %v3097_v17 = vpop.eup %3096  ;;  %1378 = vadd.xlane.f32.xlu0 %v1377_v23 }
0x11a4   :  { %v1380_v13 = vsel %vm289_vm5, %v3097_v17, 0.0 }
0x11a5   :  { %1381 = vadd.xlane.f32.xlu1 %v1380_v13  ;;  %v3051_v13 = vld [vmem:[%s3723_s4 + $0xe8] sm:$0xff]  }
0x11b6   :  { %1437 = vrot.lane.b32.xlu1 %v3410_v56, %s3136_s14 }
0x11b9   :  { %1389 = vrot.lane.b32.xlu0 %v3408_v53, %s3136_s14 }
0x1230   :  { %v1379_v2 = vpop.xlane.xlu0 %1378 }
0x1231   :  { %3098 = vrcp.f32 %v1379_v2 }
0x1232   :  { %v1382_v24 = vpop.xlane.xlu1 %1381 }
0x1233   :  { %3100 = vrcp.f32 %v1382_v24 }
0x1234   :  { %v1390_v25 = vpop.permute.xlu0 %1389 }
0x1235   :  { %v1395_v26 = vsel %vm319_vm6, %v1390_v25, 0 }
0x1236   :  { %v1438_v27 = vpop.permute.xlu1 %1437  ;;  %2891 = vmatpush3.bf16.msra.mxu1 %v1395_v26 }
0x1237   :  { %v1443_v29 = vsel %vm319_vm6, %v1438_v27, 0  ;;  %2902 = vmatprep.subr.bf16.mxu1 %v3130_v0 }
0x1238   :  { %2897 = vmatpush3.bf16.msra.mxu0 %v1443_v29 }
0x1239   :  { %2910 = vmatprep.subr.bf16.mxu0 %v3130_v0 }
0x123b   :  { %v3099_v56 = vpop.eup %3098 }
0x123c   :  { %v1385_v30 = vmul.f32 %v3099_v56, %v3095_v22 }
0x123d   :  { %v3101_v32 = vpop.eup %3100 }
0x123e   :  { %v1386_v53 = vmul.f32 %v3101_v32, %v3097_v17  ;;  %v1387_v33 = vpack.c.bf16 %v1385_v30, %v1385_v30  ;;  %v3050_v17 = vld [vmem:[%s3723_s4 + $0xe0] sm:$0xff]   ;;  %v2622_v32 = vld [vmem:[%s3725_s3 + $0xe] ss:$0 sm:$0xff] }
0x1240   :  { %2893 = vmatmul.mubr.msk.bf16.vlgmr.msra.gmra.mrb[40].mxu1 %vm289_vm5, %v1387_v33  ;;  %v1388_v34 = vpack.c.bf16 %v1386_v53, %v1386_v53 }
0x1241   :  { %2906 = vmatprep.mubr.msk.bf16.mxu1 %vm3131_vm1, %v3130_v0  ;;  %2903 = vmatpush3.bf16.msra.mxu1 %v3046_v35  ;;  %v2623_v35 = vld [vmem:[%s3725_s3 + $0xf] ss:$0 sm:$0xff] }
0x1242   :  { %2899 = vmatmul.mubr.msk.bf16.vlgmr.msra.gmra.mrb[40].mxu0 %vm289_vm5, %v1388_v34  ;;  %2904 = vmatprep.subr.bf16.mxu1 %v3130_v0 }
0x1243   :  { %2914 = vmatprep.mubr.msk.bf16.mxu0 %vm3131_vm1, %v3130_v0  ;;  %2911 = vmatpush3.bf16.msra.mxu0 %v3050_v17 }
0x1244   :  { %2912 = vmatprep.subr.bf16.mxu0 %v3130_v0 }
0x1245   :  { %2905 = vmatpush3.bf16.msra.mxu1 %v3047_v36 }
0x1246   :  { %2918 = vmatprep.subr.bf16.mxu1 %v3130_v0 }
0x1247   :  { %2913 = vmatpush3.bf16.msra.mxu0 %v3051_v13 }
0x1248   :  { %2926 = vmatprep.subr.bf16.mxu0 %v3130_v0 }
0x1313   :  { %v1431_v20 = vpop.f32.mrb[40].mxu1 }
0x1314   :  { %v2894_v21 = vpop.f32.mrb[41].mxu1 }
0x1315   :  { %v1434_v37 = vpop.f32.mrb[42].mxu1  ;;  %v1479_v38 = vpop.f32.mrb[40].mxu0 }
0x1316   :  { %v3024_v39 = vpack.i.bf16 %v1479_v38, %v1431_v20  ;;  %v2895_v40 = vpop.f32.mrb[43].mxu1  ;;  %v2900_v41 = vpop.f32.mrb[41].mxu0 }
0x1317   :  { %v1482_v42 = vpop.f32.mrb[42].mxu0  ;;  %v2624_v40 = vld [vmem:[%s3725_s3 + $0xb] ss:$0 sm:$0xff] }
0x1318   :  { %3025 = vrot.lane.b32.xlu1 %v3024_v39, %s3137_s19  ;;  %v2901_v43 = vpop.f32.mrb[43].mxu0 }
0x138a   :  { %v3026_v31 = vpop.permute.xlu1 %3025 }
0x138b   :  { %v3028_v49 = vunpack.i.h.bf16 %v3026_v31  ;;  %v3027_v50 = vunpack.i.l.bf16 %v3026_v31 }
0x138d   :  { %v1494_v52 = vsel %vm191_vm4, %v3470_v54, %v3028_v49  ;;  %v1493_v18 = vsel %vm191_vm4, %v3468_v51, %v3027_v50  ;;  %v2618_v51 = vld [vmem:[%s3725_s3 + $0xa] ss:$0 sm:$0xff] }
0x138e   :  { %v1495_v57 = vpack.c.bf16 %v1494_v52, %v1493_v18 }
0x1390   :  { %2907 = vmatmul.mubr.msk.bf16.vlgmr.msra.gmra.mrb[44].mxu1 %vm141_vm3, %v1495_v57 }
0x1391   :  { %2919 = vmatpush3.bf16.msra.mxu1 %v3048_v55  ;;  %2922 = vmatprep.mubr.msk.bf16.mxu1 %vm3131_vm1, %v3130_v0 }
0x1392   :  { %2920 = vmatprep.subr.bf16.mxu1 %v3130_v0 }
0x1395   :  { %2921 = vmatpush3.bf16.msra.mxu1 %v3049_v28 }
0x1396   :  { %2932 = vmatprep.subr.bf16.mxu1 %v3130_v0 }
0x1398   :  { %2923 = vmatmul.mubr.msk.bf16.vlgmr.msra.gmra.mrb[48].mxu1 %vm141_vm3, %v1657_v48 }
0x1399   :  { %2934 = vmatprep.mubr.msk.bf16.mxu1 %vm3131_vm1, %v3130_v0 }
0x1463   :  { %v1549_v54 = vpop.f32.mrb[44].mxu1 }
0x1464   :  { %v1550_v58 = vadd.f32 %v2618_v51, %v1549_v54  ;;  %v2908_v59 = vpop.f32.mrb[45].mxu1 }
0x1465   :  { %v1552_v60 = vpop.f32.mrb[46].mxu1 }
0x1466   :  { %v1553_v61 = vadd.f32 %v2618_v51, %v1552_v60  ;;  %v2909_v62 = vpop.f32.mrb[47].mxu1  ;;  %v1556_v63 = vadd.f32 %v1550_v58, %v3392_v46 }
0x1468   :  { %v1558_v1 = vsel %vm141_vm3, %v1556_v63, 0.0  ;;  %v1557_v44 = vadd.f32 %v1553_v61, %v3396_v47 }
0x1469   :  { %1559 = vadd.xlane.f32.xlu0 %v1558_v1 }
0x146a   :  { %v1561_v48 = vsel %vm141_vm3, %v1557_v44, 0.0 }
0x146b   :  { %1562 = vadd.xlane.f32.xlu1 %v1561_v48  ;;  %v1711_v3 = vpop.f32.mrb[48].mxu1 }
0x146c   :  { %v1712_v4 = vadd.f32 %v2628_v45, %v1711_v3  ;;  %v2924_v5 = vpop.f32.mrb[49].mxu1 }
0x146d   :  { %v1714_v6 = vpop.f32.mrb[50].mxu1 }
0x146e   :  { %v1715_v7 = vadd.f32 %v2628_v45, %v1714_v6  ;;  %v2925_v8 = vpop.f32.mrb[51].mxu1  ;;  %v3553_v20 = vpack.c.bf16 %v1712_v4, %v1712_v4 }
0x1470   :  { %v3532_v9 = vpack.c.bf16 %v1715_v7, %v1715_v7  ;;  %v1726_v39 = vsel %vm191_vm4, %v3553_v20, 0 }
0x1472   :  { %v1772_v46 = vsel %vm191_vm4, %v3532_v9, 0 }
0x1473   :  { %2933 = vmatpush3.bf16.xpose.msra.mxu1 %v1772_v46 }
0x1474   :  { %2944 = vmatprep.subr.bf16.mxu1 %v3130_v0 }
0x14f6   :  { %v1560_v47 = vpop.xlane.xlu0 %1559 }
0x14f7   :  { %v1564_v10 = vmul.f32 0.03125, %v1560_v47 }
0x14f8   :  { %v1563_v11 = vpop.xlane.xlu1 %1562 }
0x14f9   :  { %v1566_v12 = vsub.f32 %v1556_v63, %v1564_v10  ;;  %v1565_v14 = vmul.f32 0.03125, %v1563_v11 }
0x14fb   :  { %v1567_v15 = vsub.f32 %v1557_v44, %v1565_v14  ;;  %v1568_v16 = vmul.f32 %v1566_v12, %v1566_v12 }
0x14fd   :  { %v1570_v19 = vsel %vm141_vm3, %v1568_v16, 0.0  ;;  %v1569_v22 = vmul.f32 %v1567_v15, %v1567_v15 }
0x14fe   :  { %1571 = vadd.xlane.f32.xlu0 %v1570_v19 }
0x14ff   :  { %v1573_v23 = vsel %vm141_vm3, %v1569_v22, 0.0 }
0x1502   :  { %1574 = vadd.xlane.f32.xlu0 %v1573_v23 }
0x158b   :  { %v1572_v2 = vpop.xlane.xlu0 %1571 }
0x158c   :  { %v1576_v24 = vmul.f32 0.03125, %v1572_v2 }
0x158e   :  { %v1578_v25 = vadd.f32 1e-05, %v1576_v24 }
0x158f   :  { %v1575_v26 = vpop.xlane.xlu0 %1574 }
0x1590   :  { %3102 = vrsqrt.f32 %v1578_v25  ;;  %v1577_v27 = vmul.f32 0.03125, %v1575_v26 }
0x1592   :  { %v1579_v29 = vadd.f32 1e-05, %v1577_v27 }
0x1594   :  { %3104 = vrsqrt.f32 %v1579_v29 }
0x159a   :  { %v3103_v56 = vpop.eup %3102 }
0x159b   :  { %v1582_v30 = vmul.f32 %v3103_v56, %v1566_v12 }
0x159d   :  { %v1588_v33 = vmul.f32 %v2622_v32, %v1582_v30 }
0x159e   :  { %v3105_v53 = vpop.eup %3104 }
0x159f   :  { %v1583_v34 = vmul.f32 %v3105_v53, %v1567_v15  ;;  %v3555_v21 = vadd.f32 %v2623_v35, %v1588_v33 }
0x15a1   :  { %v1589_v36 = vmul.f32 %v2622_v32, %v1583_v34 }
0x15a3   :  { %v3557_v37 = vadd.f32 %v2623_v35, %v1589_v36 }
0x15a5   :  { %v1596_v38 = vpack.c.bf16 %v3557_v37, %v3555_v21 }
0x15a7   :  { %2915 = vmatmul.mubr.msk.bf16.vlgmr.msra.gmra.mrb[44].mxu0 %vm141_vm3, %v1596_v38 }
0x15a8   :  { %2927 = vmatpush3.bf16.xpose.msra.mxu0 %v1726_v39  ;;  %2928 = vmatprep.mubr.msk.bf16.mxu0 %vm3131_vm1, %v3130_v0 }
0x15a9   :  { %2938 = vmatprep.subr.bf16.mxu0 %v3130_v0 }
0x167a   :  { %v1650_v41 = vpop.f32.mrb[44].mxu0 }
0x167b   :  { %v1651_v42 = vadd.f32 %v2624_v40, %v1650_v41  ;;  %v2916_v43 = vpop.f32.mrb[45].mxu0 }
0x167c   :  { %v1653_v31 = vpop.f32.mrb[46].mxu0 }
0x167d   :  { %v1718_v49 = vpack.c.bf16 %v1651_v42, %v1651_v42  ;;  %v1654_v50 = vadd.f32 %v2624_v40, %v1653_v31  ;;  %v2917_v52 = vpop.f32.mrb[47].mxu0 }
0x167f   :  { %v1719_v18 = vpack.c.bf16 %v1654_v50, %v1654_v50  ;;  %2929 = vmatmul.mubr.msk.bf16.vlgmr.msra.gmra.mrb[48].mxu0 %vm191_vm4, %v1718_v49 }
0x1680   :  { %2940 = vmatprep.mubr.msk.bf16.mxu0 %vm3131_vm1, %v3130_v0 }
0x1681   :  { %2935 = vmatmul.mubr.msk.bf16.vlgmr.msra.gmra.mrb[52].mxu1 %vm191_vm4, %v1719_v18 }
0x1682   :  { %2946 = vmatprep.mubr.msk.bf16.mxu1 %vm3131_vm1, %v3130_v0 }
0x1752   :  { %v1762_v55 = vpop.f32.mrb[48].mxu0 }
0x1753   :  { %v1814_v57 = vmul.f32 0.25, %v1762_v55  ;;  %v2930_v28 = vpop.f32.mrb[49].mxu0 }
0x1754   :  { %v1765_v51 = vpop.f32.mrb[50].mxu0  ;;  %v1808_v54 = vpop.f32.mrb[52].mxu1 }
0x1755   :  { %v1815_v58 = vmul.f32 0.25, %v1808_v54  ;;  %v2931_v59 = vpop.f32.mrb[51].mxu0  ;;  %v2936_v60 = vpop.f32.mrb[53].mxu1  ;;  %v1816_v61 = vsel %vm289_vm5, %v1814_v57, -inf }
0x1756   :  { %v1811_v62 = vpop.f32.mrb[54].mxu1  ;;  %1817 = vmax.xlane.f32.xlu1 %v1816_v61 }
0x1757   :  { %v2937_v63 = vpop.f32.mrb[55].mxu1  ;;  %v1819_v1 = vsel %vm289_vm5, %v1815_v58, -inf }
0x1758   :  { %1820 = vmax.xlane.f32.xlu0 %v1819_v1 }
0x1767   :  { %1841 = vrot.lane.b32.xlu1 %v3553_v20, %s3132_s2 }
0x17e3   :  { %v1818_v44 = vpop.xlane.xlu1 %1817 }
0x17e4   :  { %v1822_v45 = vsub.f32 %v1814_v57, %v1818_v44 }
0x17e5   :  { %v1821_v48 = vpop.xlane.xlu0 %1820 }
0x17e6   :  { %v1824_v3 = vmul.f32 1.442695, %v1822_v45  ;;  %v1823_v4 = vsub.f32 %v1815_v58, %v1821_v48 }
0x17e7   :  { %v1842_v5 = vpop.permute.xlu1 %1841 }
0x17e8   :  { %3106 = vpow2.f32 %v1824_v3  ;;  %v1826_v6 = vmul.f32 1.442695, %v1823_v4  ;;  %v1847_v7 = vsel %vm319_vm6, %v1842_v5, 0 }
0x17e9   :  { %2939 = vmatpush3.bf16.msra.mxu0 %v1847_v7 }
0x17ea   :  { %3108 = vpow2.f32 %v1826_v6  ;;  %2950 = vmatprep.subr.bf16.mxu0 %v3130_v0 }
0x17f2   :  { %v3107_v8 = vpop.eup %3106 }
0x17f3   :  { %v1828_v46 = vsel %vm289_vm5, %v3107_v8, 0.0 }
0x17f4   :  { %v3109_v47 = vpop.eup %3108  ;;  %1829 = vadd.xlane.f32.xlu1 %v1828_v46  ;;  %v3052_v46 = vld [vmem:[%s3723_s4 + $0x120] sm:$0xff]  }
0x17f5   :  { %v1831_v10 = vsel %vm289_vm5, %v3109_v47, 0.0 }
0x17f6   :  { %1832 = vadd.xlane.f32.xlu0 %v1831_v10 }
0x1805   :  { %1941 = vrot.lane.b32.xlu1 %v3553_v20, %s3135_s13 }
0x1809   :  { %1992 = vrot.lane.b32.xlu1 %v3532_v9, %s3135_s13 }
0x180c   :  { %1890 = vrot.lane.b32.xlu0 %v3532_v9, %s3132_s2 }
0x180d   :  { %1990 = vrot.lane.b32.xlu1 %v1719_v18, %s3135_s13 }
0x1810   :  { %1939 = vrot.lane.b32.xlu0 %v1718_v49, %s3135_s13 }
0x1881   :  { %v1830_v11 = vpop.xlane.xlu1 %1829 }
0x1882   :  { %3110 = vrcp.f32 %v1830_v11 }
0x1883   :  { %v1833_v12 = vpop.xlane.xlu0 %1832 }
0x1884   :  { %3112 = vrcp.f32 %v1833_v12 }
0x1885   :  { %v1942_v16 = vpop.permute.xlu1 %1941 }
0x1886   :  { %v1947_v24 = vsel %vm191_vm4, %v1942_v16, 0 }
0x1887   :  { %v1891_v14 = vpop.permute.xlu0 %1890 }
0x1888   :  { %v1896_v15 = vsel %vm319_vm6, %v1891_v14, 0 }
0x1889   :  { %2945 = vmatpush3.bf16.msra.mxu1 %v1896_v15  ;;  %v1993_v2 = vpop.permute.xlu1 %1992 }
0x188a   :  { %2956 = vmatprep.subr.bf16.mxu1 %v3130_v0  ;;  %v1998_v26 = vsel %vm191_vm4, %v1993_v2, 0 }
0x188b   :  { %v1940_v27 = vpop.permute.xlu0 %1939 }
0x188c   :  { %v3111_v19 = vpop.eup %3110 }
0x188d   :  { %v1836_v22 = vmul.f32 %v3111_v19, %v3107_v8  ;;  %v1991_v29 = vpop.permute.xlu1 %1990 }
0x188e   :  { %v3113_v23 = vpop.eup %3112 }
0x188f   :  { %v1837_v17 = vmul.f32 %v3113_v23, %v3109_v47  ;;  %v1838_v13 = vpack.c.bf16 %v1836_v22, %v1836_v22  ;;  %v3053_v47 = vld [vmem:[%s3723_s4 + $0x128] sm:$0xff]  }
0x1891   :  { %2941 = vmatmul.mubr.msk.bf16.vlgmr.msra.gmra.mrb[52].mxu0 %vm289_vm5, %v1838_v13  ;;  %v1839_v25 = vpack.c.bf16 %v1837_v17, %v1837_v17 }
0x1892   :  { %2951 = vmatpush3.bf16.xpose.msra.mxu0 %v1947_v24  ;;  %2952 = vmatprep.mubr.msk.bf16.mxu0 %vm3131_vm1, %v3130_v0 }
0x1893   :  { %2947 = vmatmul.mubr.msk.bf16.vlgmr.msra.gmra.mrb[56].mxu1 %vm289_vm5, %v1839_v25  ;;  %2962 = vmatprep.subr.bf16.mxu0 %v3130_v0 }
0x1894   :  { %2957 = vmatpush3.bf16.xpose.msra.mxu1 %v1998_v26  ;;  %2958 = vmatprep.mubr.msk.bf16.mxu1 %vm3131_vm1, %v3130_v0 }
0x1895   :  { %2968 = vmatprep.subr.bf16.mxu1 %v3130_v0 }
0x1899   :  { %2953 = vmatmul.mubr.msk.bf16.vlgmr.msra.gmra.mrb[56].mxu0 %vm191_vm4, %v1940_v27  ;;  %v2640_v27 = vld [vmem:[%s3725_s3 + $0xd] ss:$0 sm:$0xff] }
0x189a   :  { %2964 = vmatprep.mubr.msk.bf16.mxu0 %vm3131_vm1, %v3130_v0 }
0x189b   :  { %2959 = vmatmul.mubr.msk.bf16.vlgmr.msra.gmra.mrb[60].mxu1 %vm191_vm4, %v1991_v29 }
0x189c   :  { %2970 = vmatprep.mubr.msk.bf16.mxu1 %vm3131_vm1, %v3130_v0 }
0x1964   :  { %v3610_v56 = vpop.f32.mrb[52].mxu0 }
0x1965   :  { %v2942_v30 = vpop.f32.mrb[53].mxu0 }
0x1966   :  { %v1886_v32 = vpop.f32.mrb[54].mxu0  ;;  %v3612_v53 = vpop.f32.mrb[56].mxu1 }
0x1967   :  { %v2943_v33 = vpop.f32.mrb[55].mxu0  ;;  %v2948_v34 = vpop.f32.mrb[57].mxu1 }
0x1968   :  { %v1935_v35 = vpop.f32.mrb[58].mxu1 }
0x1969   :  { %v2949_v36 = vpop.f32.mrb[59].mxu1 }
0x196c   :  { %v1983_v38 = vpop.f32.mrb[56].mxu0 }
0x196d   :  { %v2040_v39 = vmul.f32 0.25, %v1983_v38  ;;  %v2954_v40 = vpop.f32.mrb[57].mxu0 }
0x196e   :  { %v1986_v41 = vpop.f32.mrb[58].mxu0  ;;  %v2034_v42 = vpop.f32.mrb[60].mxu1 }
0x196f   :  { %v2041_v43 = vmul.f32 0.25, %v2034_v42  ;;  %v2955_v31 = vpop.f32.mrb[59].mxu0  ;;  %v2960_v49 = vpop.f32.mrb[61].mxu1  ;;  %v2042_v50 = vsel %vm289_vm5, %v2040_v39, -inf }
0x1970   :  { %v2037_v52 = vpop.f32.mrb[62].mxu1  ;;  %2043 = vmax.xlane.f32.xlu0 %v2042_v50 }
0x1971   :  { %v2961_v18 = vpop.f32.mrb[63].mxu1  ;;  %v2045_v55 = vsel %vm289_vm5, %v2041_v43, -inf }
0x1972   :  { %2046 = vmax.xlane.f32.xlu1 %v2045_v55  ;;  %v3055_v18 = vld [vmem:[%s3723_s4 + $0x148] sm:$0xff]   ;;  %v3056_v55 = vld [vmem:[%s3723_s4 + $0x160] sm:$0xff]  }
0x1983   :  { %2066 = vrot.lane.b32.xlu1 %v3553_v20, %s3134_s12 }
0x19fd   :  { %v2044_v57 = vpop.xlane.xlu0 %2043 }
0x19fe   :  { %v2048_v28 = vsub.f32 %v2040_v39, %v2044_v57  ;;  %v3057_v57 = vld [vmem:[%s3723_s4 + $0x168] sm:$0xff]  }
0x19ff   :  { %v2047_v51 = vpop.xlane.xlu1 %2046 }
0x1a00   :  { %v2050_v54 = vmul.f32 1.442695, %v2048_v28  ;;  %v2049_v58 = vsub.f32 %v2041_v43, %v2047_v51 }
0x1a02   :  { %3114 = vpow2.f32 %v2050_v54  ;;  %v2052_v59 = vmul.f32 1.442695, %v2049_v58 }
0x1a03   :  { %v2067_v60 = vpop.permute.xlu1 %2066 }
0x1a04   :  { %3116 = vpow2.f32 %v2052_v59  ;;  %v2072_v61 = vsel %vm319_vm6, %v2067_v60, 0 }
0x1a05   :  { %2963 = vmatpush3.bf16.msra.mxu0 %v2072_v61 }
0x1a06   :  { %2974 = vmatprep.subr.bf16.mxu0 %v3130_v0 }
0x1a0c   :  { %v3115_v62 = vpop.eup %3114 }
0x1a0d   :  { %v2054_v63 = vsel %vm289_vm5, %v3115_v62, 0.0 }
0x1a0e   :  { %v3117_v1 = vpop.eup %3116  ;;  %2055 = vadd.xlane.f32.xlu0 %v2054_v63 }
0x1a0f   :  { %v2057_v20 = vsel %vm289_vm5, %v3117_v1, 0.0 }
0x1a12   :  { %2058 = vadd.xlane.f32.xlu0 %v2057_v20 }
0x1a28   :  { %2114 = vrot.lane.b32.xlu0 %v3532_v9, %s3134_s12 }
0x1a9b   :  { %v2056_v44 = vpop.xlane.xlu0 %2055 }
0x1a9c   :  { %3118 = vrcp.f32 %v2056_v44 }
0x1a9f   :  { %v2059_v45 = vpop.xlane.xlu0 %2058 }
0x1aa0   :  { %3120 = vrcp.f32 %v2059_v45  ;;  %v2645_v45 = vld [vmem:[%s3725_s3 + $0x11] ss:$0 sm:$0xff] }
0x1aa3   :  { %v2115_v48 = vpop.permute.xlu0 %2114 }
0x1aa4   :  { %v2120_v3 = vsel %vm319_vm6, %v2115_v48, 0 }
0x1aa5   :  { %2969 = vmatpush3.bf16.msra.mxu1 %v2120_v3 }
0x1aa6   :  { %v3119_v4 = vpop.eup %3118  ;;  %2982 = vmatprep.subr.bf16.mxu1 %v3130_v0 }
0x1aa7   :  { %v2062_v5 = vmul.f32 %v3119_v4, %v3115_v62  ;;  %v2644_v62 = vld [vmem:[%s3725_s3 + $0x10] ss:$0 sm:$0xff] }
0x1aa9   :  { %v2064_v6 = vpack.c.bf16 %v2062_v5, %v2062_v5 }
0x1aaa   :  { %v3121_v7 = vpop.eup %3120 }
0x1aab   :  { %v2063_v8 = vmul.f32 %v3121_v7, %v3117_v1  ;;  %2965 = vmatmul.mubr.msk.bf16.vlgmr.msra.gmra.mrb[60].mxu0 %vm289_vm5, %v2064_v6  ;;  %v3058_v6 = vld [vmem:[%s3723_s4 + $0x170] sm:$0xff]   ;;  %v3059_v7 = vld [vmem:[%s3723_s4 + $0x178] sm:$0xff]  }
0x1aac   :  { %2978 = vmatprep.mubr.msk.bf16.mxu0 %vm3131_vm1, %v3130_v0  ;;  %2975 = vmatpush3.bf16.msra.mxu0 %v3052_v46 }
0x1aad   :  { %v2065_v9 = vpack.c.bf16 %v2063_v8, %v2063_v8  ;;  %2976 = vmatprep.subr.bf16.mxu0 %v3130_v0  ;;  %v2646_v8 = vld [vmem:[%s3725_s3 + $0x14] ss:$0 sm:$0xff] }
0x1aaf   :  { %2971 = vmatmul.mubr.msk.bf16.vlgmr.msra.gmra.mrb[64].mxu1 %vm289_vm5, %v2065_v9 }
0x1ab0   :  { %2986 = vmatprep.mubr.msk.bf16.mxu1 %vm3131_vm1, %v3130_v0  ;;  %2977 = vmatpush3.bf16.msra.mxu0 %v3053_v47 }
0x1ab1   :  { %2990 = vmatprep.subr.bf16.mxu0 %v3130_v0 }
0x1b7e   :  { %v2108_v10 = vpop.f32.mrb[60].mxu0 }
0x1b7f   :  { %v2966_v11 = vpop.f32.mrb[61].mxu0 }
0x1b80   :  { %v2111_v12 = vpop.f32.mrb[62].mxu0 }
0x1b81   :  { %v2967_v14 = vpop.f32.mrb[63].mxu0 }
0x1b82   :  { %v2156_v15 = vpop.f32.mrb[64].mxu1 }
0x1b83   :  { %v3029_v16 = vpack.i.bf16 %v2156_v15, %v2108_v10  ;;  %v2972_v19 = vpop.f32.mrb[65].mxu1 }
0x1b84   :  { %v2159_v22 = vpop.f32.mrb[66].mxu1  ;;  %v2650_v19 = vld [vmem:[%s3725_s3 + $0x15] ss:$0 sm:$0xff] }
0x1b85   :  { %v2973_v23 = vpop.f32.mrb[67].mxu1  ;;  %3030 = vrot.lane.b32.xlu1 %v3029_v16, %s3137_s19 }
0x1bf7   :  { %v3031_v17 = vpop.permute.xlu1 %3030 }
0x1bf8   :  { %v3033_v13 = vunpack.i.h.bf16 %v3031_v17  ;;  %v3032_v2 = vunpack.i.l.bf16 %v3031_v17 }
0x1bfa   :  { %v2171_v24 = vsel %vm191_vm4, %v3612_v53, %v3033_v13  ;;  %v2170_v25 = vsel %vm191_vm4, %v3610_v56, %v3032_v2 }
0x1bfb   :  { %v2172_v26 = vpack.c.bf16 %v2171_v24, %v2170_v25 }
0x1bfd   :  { %2979 = vmatmul.mubr.msk.bf16.vlgmr.msra.gmra.mrb[64].mxu0 %vm141_vm3, %v2172_v26 }
0x1bfe   :  { %2998 = vmatprep.mubr.msk.bf16.mxu0 %vm3131_vm1, %v3130_v0  ;;  %2991 = vmatpush3.bf16.msra.mxu0 %v3056_v55 }
0x1bff   :  { %2992 = vmatprep.subr.bf16.mxu0 %v3130_v0 }
0x1c02   :  { %2993 = vmatpush3.bf16.msra.mxu0 %v3057_v57 }
0x1c03   :  { %2994 = vmatprep.subr.bf16.mxu0 %v3130_v0 }
0x1c06   :  { %2995 = vmatpush3.bf16.msra.mxu0 %v3058_v6 }
0x1c07   :  { %2996 = vmatprep.subr.bf16.mxu0 %v3130_v0 }
0x1c0a   :  { %2997 = vmatpush3.bf16.msra.mxu0 %v3059_v7 }
0x1cd0   :  { %v2226_v29 = vpop.f32.mrb[64].mxu0 }
0x1cd1   :  { %v2227_v30 = vadd.f32 %v2640_v27, %v2226_v29  ;;  %v2980_v32 = vpop.f32.mrb[65].mxu0 }
0x1cd2   :  { %v2229_v33 = vpop.f32.mrb[66].mxu0 }
0x1cd3   :  { %v2230_v34 = vadd.f32 %v2640_v27, %v2229_v33  ;;  %v2981_v35 = vpop.f32.mrb[67].mxu0  ;;  %v2233_v53 = vadd.f32 %v2227_v30, %v3555_v21 }
0x1cd5   :  { %v2235_v56 = vsel %vm141_vm3, %v2233_v53, 0.0  ;;  %v2234_v36 = vadd.f32 %v2230_v34, %v3557_v37  ;;  %v3054_v37 = vld [vmem:[%s3723_s4 + $0x140] sm:$0xff]  }
0x1cd6   :  { %2236 = vadd.xlane.f32.xlu1 %v2235_v56  ;;  %2983 = vmatpush3.bf16.msra.mxu1 %v3054_v37  ;;  %v2656_v37 = vld [vmem:[%s3725_s3 + $0x12] ss:$0 sm:$0xff] }
0x1cd7   :  { %v2238_v38 = vsel %vm141_vm3, %v2234_v36, 0.0  ;;  %2984 = vmatprep.subr.bf16.mxu1 %v3130_v0 }
0x1cd8   :  { %2239 = vadd.xlane.f32.xlu0 %v2238_v38 }
0x1cda   :  { %2985 = vmatpush3.bf16.msra.mxu1 %v3055_v18 }
0x1cdb   :  { %3002 = vmatprep.subr.bf16.mxu1 %v3130_v0 }
0x1d63   :  { %v2237_v39 = vpop.xlane.xlu1 %2236 }
0x1d64   :  { %v2241_v40 = vmul.f32 0.03125, %v2237_v39 }
0x1d65   :  { %v2240_v41 = vpop.xlane.xlu0 %2239 }
0x1d66   :  { %v2243_v42 = vsub.f32 %v2233_v53, %v2241_v40  ;;  %v2242_v43 = vmul.f32 0.03125, %v2240_v41  ;;  %v3060_v40 = vld [vmem:[%s3723_s4 + $0x180] sm:$0xff]   ;;  %v3061_v41 = vld [vmem:[%s3723_s4 + $0x188] sm:$0xff]  }
0x1d68   :  { %v2244_v31 = vsub.f32 %v2234_v36, %v2242_v43  ;;  %v2245_v49 = vmul.f32 %v2243_v42, %v2243_v42 }
0x1d6a   :  { %v2247_v50 = vsel %vm141_vm3, %v2245_v49, 0.0  ;;  %v2246_v52 = vmul.f32 %v2244_v31, %v2244_v31 }
0x1d6b   :  { %2248 = vadd.xlane.f32.xlu0 %v2247_v50 }
0x1d6c   :  { %v2250_v21 = vsel %vm141_vm3, %v2246_v52, 0.0 }
0x1d6d   :  { %2251 = vadd.xlane.f32.xlu1 %v2250_v21 }
0x1df8   :  { %v2249_v28 = vpop.xlane.xlu0 %2248 }
0x1df9   :  { %v2253_v51 = vmul.f32 0.03125, %v2249_v28 }
0x1dfa   :  { %v2252_v54 = vpop.xlane.xlu1 %2251 }
0x1dfb   :  { %v2255_v58 = vadd.f32 1e-05, %v2253_v51  ;;  %v2254_v59 = vmul.f32 0.03125, %v2252_v54 }
0x1dfd   :  { %3122 = vrsqrt.f32 %v2255_v58  ;;  %v2256_v60 = vadd.f32 1e-05, %v2254_v59 }
0x1dff   :  { %3124 = vrsqrt.f32 %v2256_v60  ;;  %v2662_v60 = vld [vmem:[%s3725_s3 + $0x16] ss:$0 sm:$0xff] }
0x1e07   :  { %v3123_v61 = vpop.eup %3122 }
0x1e08   :  { %v2259_v63 = vmul.f32 %v3123_v61, %v2243_v42 }
0x1e09   :  { %v3125_v1 = vpop.eup %3124 }
0x1e0a   :  { %v2265_v20 = vmul.f32 %v2644_v62, %v2259_v63  ;;  %v2260_v44 = vmul.f32 %v3125_v1, %v2244_v31 }
0x1e0c   :  { %v2266_v48 = vmul.f32 %v2644_v62, %v2260_v44  ;;  %v2271_v3 = vadd.f32 %v2645_v45, %v2265_v20 }
0x1e0e   :  { %v2272_v4 = vadd.f32 %v2645_v45, %v2266_v48 }
0x1e10   :  { %v2273_v5 = vpack.c.bf16 %v2272_v4, %v2271_v3 }
0x1e12   :  { %2987 = vmatmul.mubr.msk.bf16.vlgmr.msra.gmra.mrb[68].mxu1 %vm141_vm3, %v2273_v5 }
0x1e13   :  { %3006 = vmatprep.mubr.msk.bf16.mxu1 %vm3131_vm1, %v3130_v0  ;;  %3003 = vmatpush3.bf16.msra.mxu1 %v3060_v40 }
0x1e14   :  { %3004 = vmatprep.subr.bf16.mxu1 %v3130_v0  ;;  %v2657_v0 = vld [vmem:[%s3725_s3 + $0x13] ss:$0 sm:$0xff] }
0x1e17   :  { %3005 = vmatpush3.bf16.msra.mxu1 %v3061_v41 }
0x1ee5   :  { %v2327_v9 = vpop.f32.mrb[68].mxu1 }
0x1ee6   :  { %v2328_v46 = vadd.f32 %v2646_v8, %v2327_v9  ;;  %v2988_v47 = vpop.f32.mrb[69].mxu1 }
0x1ee7   :  { %v2330_v10 = vpop.f32.mrb[70].mxu1 }
0x1ee8   :  { %v2331_v11 = vadd.f32 %v2646_v8, %v2330_v10  ;;  %v2989_v12 = vpop.f32.mrb[71].mxu1  ;;  %v2334_v14 = vmax.f32 %v2328_v46, 0.0 }
0x1eea   :  { %v2335_v15 = vmax.f32 %v2331_v11, 0.0 }
0x1eec   :  { %v2336_v16 = vpack.c.bf16 %v2335_v15, %v2334_v14 }
0x1eee   :  { %2999 = vmatmul.mubr.msk.bf16.vlgmr.msra.gmra.mrb[68].mxu0 %vm837_vm7, %v2336_v16 }
0x1fc1   :  { %v2402_v22 = vpop.f32.mrb[68].mxu0 }
0x1fc2   :  { %v2403_v23 = vadd.f32 %v2650_v19, %v2402_v22  ;;  %v3000_v17 = vpop.f32.mrb[69].mxu0 }
0x1fc3   :  { %v2405_v13 = vpop.f32.mrb[70].mxu0 }
0x1fc4   :  { %v2406_v2 = vadd.f32 %v2650_v19, %v2405_v13  ;;  %v3001_v24 = vpop.f32.mrb[71].mxu0  ;;  %v2409_v25 = vadd.f32 %v2403_v23, %v2271_v3 }
0x1fc6   :  { %v2411_v26 = vsel %vm141_vm3, %v2409_v25, 0.0  ;;  %v2410_v27 = vadd.f32 %v2406_v2, %v2272_v4 }
0x1fc7   :  { %2412 = vadd.xlane.f32.xlu0 %v2411_v26 }
0x1fc8   :  { %v2414_v29 = vsel %vm141_vm3, %v2410_v27, 0.0 }
0x1fc9   :  { %2415 = vadd.xlane.f32.xlu1 %v2414_v29 }
0x2054   :  { %v2413_v30 = vpop.xlane.xlu0 %2412 }
0x2055   :  { %v2417_v32 = vmul.f32 0.03125, %v2413_v30 }
0x2056   :  { %v2416_v33 = vpop.xlane.xlu1 %2415 }
0x2057   :  { %v2419_v34 = vsub.f32 %v2409_v25, %v2417_v32  ;;  %v2418_v35 = vmul.f32 0.03125, %v2416_v33 }
0x2059   :  { %v2420_v53 = vsub.f32 %v2410_v27, %v2418_v35  ;;  %v2421_v56 = vmul.f32 %v2419_v34, %v2419_v34 }
0x205b   :  { %v2423_v36 = vsel %vm141_vm3, %v2421_v56, 0.0  ;;  %v2422_v38 = vmul.f32 %v2420_v53, %v2420_v53 }
0x205c   :  { %2424 = vadd.xlane.f32.xlu0 %v2423_v36 }
0x205d   :  { %v2426_v39 = vsel %vm141_vm3, %v2422_v38, 0.0 }
0x205e   :  { %2427 = vadd.xlane.f32.xlu1 %v2426_v39 }
0x20e9   :  { %v2425_v42 = vpop.xlane.xlu0 %2424 }
0x20ea   :  { %v2429_v43 = vmul.f32 0.03125, %v2425_v42 }
0x20eb   :  { %v2428_v31 = vpop.xlane.xlu1 %2427 }
0x20ec   :  { %v2431_v49 = vadd.f32 1e-05, %v2429_v43  ;;  %v2430_v50 = vmul.f32 0.03125, %v2428_v31 }
0x20ee   :  { %3126 = vrsqrt.f32 %v2431_v49  ;;  %v2432_v52 = vadd.f32 1e-05, %v2430_v50 }
0x20f0   :  { %3128 = vrsqrt.f32 %v2432_v52 }
0x20f8   :  { %v3127_v21 = vpop.eup %3126 }
0x20f9   :  { %v2435_v18 = vmul.f32 %v3127_v21, %v2419_v34 }
0x20fa   :  { %v3129_v55 = vpop.eup %3128 }
0x20fb   :  { %v2441_v57 = vmul.f32 %v2656_v37, %v2435_v18  ;;  %v2436_v28 = vmul.f32 %v3129_v55, %v2420_v53 }
0x20fd   :  { %v2442_v51 = vmul.f32 %v2656_v37, %v2436_v28  ;;  %v2447_v54 = vadd.f32 %v2657_v0, %v2441_v57 }
0x20ff   :  { %v2448_v58 = vadd.f32 %v2657_v0, %v2442_v51 }
0x2101   :  { %v2455_v59 = vpack.c.bf16 %v2448_v58, %v2447_v54 }
0x2103   :  { %3007 = vmatmul.mubr.msk.bf16.vlgmr.msra.gmra.mrb[72].mxu1 %vm141_vm3, %v2455_v59 }
0x21d6   :  { %v2509_v61 = vpop.f32.mrb[72].mxu1 }
0x21d7   :  { %v2510_v62 = vadd.f32 %v2662_v60, %v2509_v61  ;;  %v3008_v63 = vpop.f32.mrb[73].mxu1 }
0x21d8   :  { %v2512_v1 = vpop.f32.mrb[74].mxu1 }
0x21d9   :  { %2516 = vst [vmem:[%s3728_s5] sm:$0xff] %v2510_v62  ;;  %v2513_v20 = vadd.f32 %v2662_v60, %v2512_v1  ;;  %v3009_v44 = vpop.f32.mrb[75].mxu1 }
0x21db   :  { %2517 = vst [vmem:[%s3728_s5 + $0x8] sm:$0xff] %v2513_v20 }

</bundles_post_ra>
